<compile_context>
chip_gen: v6e
topology: v6e:2x2x1
jax: 0.10.0
libtpu: 0.0.40
codegen_flags: <defaults>
</compile_context>

<pallas_src>
import functools

import jax
import jax.numpy as jnp
import numpy as np
from jax.experimental import pallas as pl
from jax.experimental.pallas import tpu as pltpu

NUM_CLASSES = 80      # vocabulary / output classes
EMB_DIM = 8
NUM_HIDDEN = 100

HP = 128              # padded hidden size (lane tile)
CP = 128              # padded number of classes (lane tile)


def lstm_fc_kernel(T, B, H,
                   emb_ref, h0_ref, c0_ref, wih_ref, whh_ref, b_ref,
                   wfc_ref, bfc_ref,
                   logits_ref, hout_ref, cout_ref):
    """Single-invocation LSTM + final FC.

    emb_ref : (T*B, E)   time-major, flattened, zero-padded batch
    h0/c0   : (B, H)     padded initial state
    wih_ref : (E, 4H)    fused input-projection weights (gate order i,f,g,o)
    whh_ref : (H, 4H)    fused recurrent weights
    b_ref   : (1, 4H)    combined bias (b_ih + b_hh)
    wfc_ref : (H, C)     fc weight (transposed), bfc_ref: (1, C)
    """
    # Hoisted loads (single read of each weight operand).
    whh = whh_ref[...]                                        # (H, 4H)

    # One big matmul for the input projection of every time step, bias folded.
    xp = (jnp.dot(emb_ref[...], wih_ref[...],
                  preferred_element_type=jnp.float32)
          + b_ref[...])                                       # (T*B, 4H)

    h = h0_ref[...]                                           # (B, H)
    c = c0_ref[...]                                           # (B, H)

    # Fully unrolled recurrence: one MXU matmul per step on the critical path.
    for t in range(T):
        g = xp[t * B:(t + 1) * B, :] + jnp.dot(
            h, whh, preferred_element_type=jnp.float32)       # (B, 4H)
        i_g = jax.nn.sigmoid(g[:, 0 * H:1 * H])
        f_g = jax.nn.sigmoid(g[:, 1 * H:2 * H])
        g_g = jnp.tanh(g[:, 2 * H:3 * H])
        o_g = jax.nn.sigmoid(g[:, 3 * H:4 * H])
        c = f_g * c + i_g * g_g
        h = o_g * jnp.tanh(c)

    # Final state + fused FC on h_T.  (Always written, even for T == 0.)
    hout_ref[...] = h
    cout_ref[...] = c
    logits_ref[...] = (jnp.dot(h, wfc_ref[...],
                               preferred_element_type=jnp.float32)
                       + bfc_ref[...])


def pack_params(params, hp=HP, cp=CP):
    """Fuse per-gate weights into (., 4*HP) and zero-pad to hardware tiles."""
    E = params["w_ih"].shape[1]
    H = params["w_ih"].shape[2]
    C = params["w_fc"].shape[1]
    w_ih_f = jnp.concatenate(
        [jnp.pad(params["w_ih"][k], ((0, 0), (0, hp - H))) for k in range(4)],
        axis=1)                                               # (E, 4*HP)
    w_hh_f = jnp.concatenate(
        [jnp.pad(params["w_hh"][k], ((0, hp - H), (0, hp - H)))
         for k in range(4)], axis=1)                          # (HP, 4*HP)
    b_f = jnp.concatenate(
        [jnp.pad(params["b"][k], ((0, 0), (0, hp - H))) for k in range(4)],
        axis=1)                                               # (1, 4*HP)
    w_fc_p = jnp.pad(params["w_fc"], ((0, hp - H), (0, cp - C)))   # (HP, CP)
    b_fc_p = jnp.pad(params["b_fc"], ((0, 0), (0, cp - C)))        # (1, CP)
    return {
        "embedding": params["embedding"].astype(jnp.float32),
        "w_ih_f": w_ih_f.astype(jnp.float32),
        "w_hh_f": w_hh_f.astype(jnp.float32),
        "b_f": b_f.astype(jnp.float32),
        "w_fc_p": w_fc_p.astype(jnp.float32),
        "b_fc_p": b_fc_p.astype(jnp.float32),
    }


@jax.jit
def net_forward(x_tokens, prev_state, packed):
    """x_tokens: int (B, T); prev_state: (h0, c0) each (1, B, NUM_HIDDEN)."""
    B, T = x_tokens.shape
    E = packed["embedding"].shape[1]
    H = NUM_HIDDEN
    C = NUM_CLASSES
    BP = ((B + 7) // 8) * 8                     # sublane-pad batch

    # Embedding gather + time-major flatten (plain-JAX glue; tiny).
    emb = jnp.take(packed["embedding"], x_tokens, axis=0)     # (B, T, E)
    emb_tm = jnp.transpose(emb, (1, 0, 2)).astype(jnp.float32)  # (T, B, E)
    emb_p = jnp.pad(emb_tm, ((0, 0), (0, BP - B), (0, 0))).reshape(T * BP, E)

    h0 = jnp.pad(prev_state[0][0].astype(jnp.float32),
                 ((0, BP - B), (0, HP - H)))                  # (BP, HP)
    c0 = jnp.pad(prev_state[1][0].astype(jnp.float32),
                 ((0, BP - B), (0, HP - H)))                  # (BP, HP)

    kernel = functools.partial(lstm_fc_kernel, T, BP, HP)

    logits_p, h_p, c_p = pl.pallas_call(
        kernel,
        out_shape=(
            jax.ShapeDtypeStruct((BP, CP), jnp.float32),
            jax.ShapeDtypeStruct((BP, HP), jnp.float32),
            jax.ShapeDtypeStruct((BP, HP), jnp.float32),
        ),
        grid_spec=pltpu.PrefetchScalarGridSpec(
            num_scalar_prefetch=0,
            grid=(1,),
            in_specs=[
                pl.BlockSpec((T * BP, E), lambda i: (0, 0)),   # embedded seq
                pl.BlockSpec((BP, HP), lambda i: (0, 0)),      # h0
                pl.BlockSpec((BP, HP), lambda i: (0, 0)),      # c0
                pl.BlockSpec((E, 4 * HP), lambda i: (0, 0)),   # fused W_ih
                pl.BlockSpec((HP, 4 * HP), lambda i: (0, 0)),  # fused W_hh
                pl.BlockSpec((1, 4 * HP), lambda i: (0, 0)),   # fused bias
                pl.BlockSpec((HP, CP), lambda i: (0, 0)),      # fc weight
                pl.BlockSpec((1, CP), lambda i: (0, 0)),       # fc bias
            ],
            out_specs=[
                pl.BlockSpec((BP, CP), lambda i: (0, 0)),
                pl.BlockSpec((BP, HP), lambda i: (0, 0)),
                pl.BlockSpec((BP, HP), lambda i: (0, 0)),
            ],
        ),
        compiler_params=pltpu.CompilerParams(
            dimension_semantics=("arbitrary",)),
    )(emb_p, h0, c0, packed["w_ih_f"], packed["w_hh_f"], packed["b_f"],
      packed["w_fc_p"], packed["b_fc_p"])

    logits = logits_p[:B, :C]
    h_n = h_p[:B, :H]
    c_n = c_p[:B, :H]
    return logits, (h_n[None], c_n[None])


def ref_forward(x_tokens, prev_state, params):
    """Pure-JAX reference (same math) for correctness check."""
    emb = jnp.take(params["embedding"], x_tokens, axis=0).astype(jnp.float32)
    h0 = prev_state[0][0]
    c0 = prev_state[1][0]

    def step(carry, x_t):
        h, c = carry
        gates = [x_t @ params["w_ih"][k] + h @ params["w_hh"][k]
                 + params["b"][k, 0] for k in range(4)]
        i_g = jax.nn.sigmoid(gates[0])
        f_g = jax.nn.sigmoid(gates[1])
        g_g = jnp.tanh(gates[2])
        o_g = jax.nn.sigmoid(gates[3])
        c = f_g * c + i_g * g_g
        h = o_g * jnp.tanh(c)
        return (h, c), None

    (h, c), _ = jax.lax.scan(step, (h0, c0), jnp.transpose(emb, (1, 0, 2)))
    logits = h @ params["w_fc"] + params["b_fc"][0]
    return logits, (h[None], c[None])


def init_params(key, num_classes=NUM_CLASSES, emb_dim=EMB_DIM, hidden=NUM_HIDDEN):
    ks = jax.random.split(key, 6)
    k_lstm = 1.0 / np.sqrt(hidden)
    k_fc = 1.0 / np.sqrt(hidden)
    return {
        # nn.Embedding default init ~ N(0, 1)
        "embedding": jax.random.normal(ks[0], (num_classes, emb_dim), jnp.float32),
        # LSTM weights stored transposed & split per gate: (4, in, H), gate order i,f,g,o
        "w_ih": jax.random.uniform(ks[1], (4, emb_dim, hidden), jnp.float32,
                                   -k_lstm, k_lstm),
        "w_hh": jax.random.uniform(ks[2], (4, hidden, hidden), jnp.float32,
                                   -k_lstm, k_lstm),
        # combined bias (b_ih + b_hh), kept 2-D rows for clean broadcasting
        "b": jax.random.uniform(ks[3], (4, 1, hidden), jnp.float32,
                                -2 * k_lstm, 2 * k_lstm),
        # fc: stored transposed (H, C)
        "w_fc": jax.random.uniform(ks[4], (hidden, num_classes), jnp.float32,
                                   -k_fc, k_fc),
        "b_fc": jax.random.uniform(ks[5], (1, num_classes), jnp.float32,
                                   -k_fc, k_fc),
    }


if __name__ == "__main__":
    key = jax.random.PRNGKey(0)
    k_par, k_tok = jax.random.split(key)

    B, T = 4, 8          # small batch / sequence; model dims follow the module
    params = init_params(k_par)
    packed = pack_params(params)

    x = jax.random.randint(k_tok, (B, T), 0, NUM_CLASSES, dtype=jnp.int32)
    # zero_state(batch_size)
    prev_state = (jnp.zeros((1, B, NUM_HIDDEN), jnp.float32),
                  jnp.zeros((1, B, NUM_HIDDEN), jnp.float32))

    logits, (h_n, c_n) = net_forward(x, prev_state, packed)
    jax.block_until_ready((logits, h_n, c_n))

    ref_logits, (ref_h, ref_c) = ref_forward(x, prev_state, params)
    np.testing.assert_allclose(np.asarray(logits), np.asarray(ref_logits),
                               rtol=1e-5, atol=1e-5)
    np.testing.assert_allclose(np.asarray(h_n), np.asarray(ref_h),
                               rtol=1e-5, atol=1e-5)
    np.testing.assert_allclose(np.asarray(c_n), np.asarray(ref_c),
                               rtol=1e-5, atol=1e-5)

    assert logits.shape == (B, NUM_CLASSES)
    assert h_n.shape == (1, B, NUM_HIDDEN) and c_n.shape == (1, B, NUM_HIDDEN)
    print("KERNEL_OK")
</pallas_src>

<mosaic_0001>
module attributes {stable_mosaic.version = 11 : i64} {
  func.func @lstm_fc_kernel(%arg0: i32, %arg1: memref<64x8xf32, #tpu.memory_space<vmem>>, %arg2: memref<8x128xf32, #tpu.memory_space<vmem>>, %arg3: memref<8x128xf32, #tpu.memory_space<vmem>>, %arg4: memref<8x512xf32, #tpu.memory_space<vmem>>, %arg5: memref<128x512xf32, #tpu.memory_space<vmem>>, %arg6: memref<1x512xf32, #tpu.memory_space<vmem>>, %arg7: memref<128x128xf32, #tpu.memory_space<vmem>>, %arg8: memref<1x128xf32, #tpu.memory_space<vmem>>, %arg9: memref<8x128xf32, #tpu.memory_space<vmem>>, %arg10: memref<8x128xf32, #tpu.memory_space<vmem>>, %arg11: memref<8x128xf32, #tpu.memory_space<vmem>>) attributes {dimension_semantics = [#tpu.dimension_semantics<arbitrary>], iteration_bounds = array<i64: 1>, scalar_prefetch = 0 : i64, scratch_operands = 0 : i64, tpu.core_type = #tpu.core_type<tc>, window_params = [{pipeline_mode = #tpu.pipeline_mode<synchronous>, transform_indices = @transform_0, window_bounds = array<i64: 64, 8>}, {pipeline_mode = #tpu.pipeline_mode<synchronous>, transform_indices = @transform_1, window_bounds = array<i64: 8, 128>}, {pipeline_mode = #tpu.pipeline_mode<synchronous>, transform_indices = @transform_2, window_bounds = array<i64: 8, 128>}, {pipeline_mode = #tpu.pipeline_mode<synchronous>, transform_indices = @transform_3, window_bounds = array<i64: 8, 512>}, {pipeline_mode = #tpu.pipeline_mode<synchronous>, transform_indices = @transform_4, window_bounds = array<i64: 128, 512>}, {pipeline_mode = #tpu.pipeline_mode<synchronous>, transform_indices = @transform_5, window_bounds = array<i64: 1, 512>}, {pipeline_mode = #tpu.pipeline_mode<synchronous>, transform_indices = @transform_6, window_bounds = array<i64: 128, 128>}, {pipeline_mode = #tpu.pipeline_mode<synchronous>, transform_indices = @transform_7, window_bounds = array<i64: 1, 128>}, {pipeline_mode = #tpu.pipeline_mode<synchronous>, transform_indices = @transform_8, window_bounds = array<i64: 8, 128>}, {pipeline_mode = #tpu.pipeline_mode<synchronous>, transform_indices = @transform_9, window_bounds = array<i64: 8, 128>}, {pipeline_mode = #tpu.pipeline_mode<synchronous>, transform_indices = @transform_10, window_bounds = array<i64: 8, 128>}]} {
    %c0 = arith.constant 0 : index
    %c0_0 = arith.constant 0 : index
    %0 = vector.load %arg5[%c0, %c0_0] : memref<128x512xf32, #tpu.memory_space<vmem>>, vector<128x512xf32>
    %c0_1 = arith.constant 0 : index
    %c0_2 = arith.constant 0 : index
    %1 = vector.load %arg1[%c0_1, %c0_2] : memref<64x8xf32, #tpu.memory_space<vmem>>, vector<64x8xf32>
    %c0_3 = arith.constant 0 : index
    %c0_4 = arith.constant 0 : index
    %2 = vector.load %arg4[%c0_3, %c0_4] : memref<8x512xf32, #tpu.memory_space<vmem>>, vector<8x512xf32>
    %cst = arith.constant dense<0.000000e+00> : vector<64x512xf32>
    %3 = tpu.matmul %1, %2, %cst {dimension_numbers = #tpu.dot_dimension_numbers<[1], [0], [0], [1], [0, 0, 1, 1], [], []>} : vector<64x8xf32>, vector<8x512xf32>, vector<64x512xf32> -> vector<64x512xf32>
    %c0_5 = arith.constant 0 : index
    %c0_6 = arith.constant 0 : index
    %4 = vector.load %arg6[%c0_5, %c0_6] : memref<1x512xf32, #tpu.memory_space<vmem>>, vector<1x512xf32>
    %5 = vector.broadcast %4 : vector<1x512xf32> to vector<64x512xf32>
    %6 = arith.addf %3, %5 : vector<64x512xf32>
    %c0_7 = arith.constant 0 : index
    %c0_8 = arith.constant 0 : index
    %7 = vector.load %arg2[%c0_7, %c0_8] : memref<8x128xf32, #tpu.memory_space<vmem>>, vector<8x128xf32>
    %c0_9 = arith.constant 0 : index
    %c0_10 = arith.constant 0 : index
    %8 = vector.load %arg3[%c0_9, %c0_10] : memref<8x128xf32, #tpu.memory_space<vmem>>, vector<8x128xf32>
    %9 = vector.extract_strided_slice %6 {offsets = [0, 0], sizes = [8, 512], strides = [1, 1]} : vector<64x512xf32> to vector<8x512xf32>
    %cst_11 = arith.constant dense<0.000000e+00> : vector<8x512xf32>
    %10 = tpu.matmul %7, %0, %cst_11 {dimension_numbers = #tpu.dot_dimension_numbers<[1], [0], [0], [1], [0, 0, 1, 1], [], []>} : vector<8x128xf32>, vector<128x512xf32>, vector<8x512xf32> -> vector<8x512xf32>
    %11 = arith.addf %9, %10 : vector<8x512xf32>
    %12 = vector.extract_strided_slice %11 {offsets = [0, 0], sizes = [8, 128], strides = [1, 1]} : vector<8x512xf32> to vector<8x128xf32>
    %13 = arith.negf %12 : vector<8x128xf32>
    %14 = math.exp %13 : vector<8x128xf32>
    %cst_12 = arith.constant 1.000000e+00 : f32
    %15 = vector.broadcast %cst_12 : f32 to vector<8x128xf32>
    %16 = arith.addf %15, %14 : vector<8x128xf32>
    %17 = arith.divf %15, %16 : vector<8x128xf32>
    %18 = vector.extract_strided_slice %11 {offsets = [0, 128], sizes = [8, 128], strides = [1, 1]} : vector<8x512xf32> to vector<8x128xf32>
    %19 = arith.negf %18 : vector<8x128xf32>
    %20 = math.exp %19 : vector<8x128xf32>
    %cst_13 = arith.constant 1.000000e+00 : f32
    %21 = vector.broadcast %cst_13 : f32 to vector<8x128xf32>
    %22 = arith.addf %21, %20 : vector<8x128xf32>
    %23 = arith.divf %21, %22 : vector<8x128xf32>
    %24 = vector.extract_strided_slice %11 {offsets = [0, 256], sizes = [8, 128], strides = [1, 1]} : vector<8x512xf32> to vector<8x128xf32>
    %25 = math.tanh %24 : vector<8x128xf32>
    %26 = vector.extract_strided_slice %11 {offsets = [0, 384], sizes = [8, 128], strides = [1, 1]} : vector<8x512xf32> to vector<8x128xf32>
    %27 = arith.negf %26 : vector<8x128xf32>
    %28 = math.exp %27 : vector<8x128xf32>
    %cst_14 = arith.constant 1.000000e+00 : f32
    %29 = vector.broadcast %cst_14 : f32 to vector<8x128xf32>
    %30 = arith.addf %29, %28 : vector<8x128xf32>
    %31 = arith.divf %29, %30 : vector<8x128xf32>
    %32 = arith.mulf %23, %8 : vector<8x128xf32>
    %33 = arith.mulf %17, %25 : vector<8x128xf32>
    %34 = arith.addf %32, %33 : vector<8x128xf32>
    %35 = math.tanh %34 : vector<8x128xf32>
    %36 = arith.mulf %31, %35 : vector<8x128xf32>
    %37 = vector.extract_strided_slice %6 {offsets = [8, 0], sizes = [8, 512], strides = [1, 1]} : vector<64x512xf32> to vector<8x512xf32>
    %cst_15 = arith.constant dense<0.000000e+00> : vector<8x512xf32>
    %38 = tpu.matmul %36, %0, %cst_15 {dimension_numbers = #tpu.dot_dimension_numbers<[1], [0], [0], [1], [0, 0, 1, 1], [], []>} : vector<8x128xf32>, vector<128x512xf32>, vector<8x512xf32> -> vector<8x512xf32>
    %39 = arith.addf %37, %38 : vector<8x512xf32>
    %40 = vector.extract_strided_slice %39 {offsets = [0, 0], sizes = [8, 128], strides = [1, 1]} : vector<8x512xf32> to vector<8x128xf32>
    %41 = arith.negf %40 : vector<8x128xf32>
    %42 = math.exp %41 : vector<8x128xf32>
    %cst_16 = arith.constant 1.000000e+00 : f32
    %43 = vector.broadcast %cst_16 : f32 to vector<8x128xf32>
    %44 = arith.addf %43, %42 : vector<8x128xf32>
    %45 = arith.divf %43, %44 : vector<8x128xf32>
    %46 = vector.extract_strided_slice %39 {offsets = [0, 128], sizes = [8, 128], strides = [1, 1]} : vector<8x512xf32> to vector<8x128xf32>
    %47 = arith.negf %46 : vector<8x128xf32>
    %48 = math.exp %47 : vector<8x128xf32>
    %cst_17 = arith.constant 1.000000e+00 : f32
    %49 = vector.broadcast %cst_17 : f32 to vector<8x128xf32>
    %50 = arith.addf %49, %48 : vector<8x128xf32>
    %51 = arith.divf %49, %50 : vector<8x128xf32>
    %52 = vector.extract_strided_slice %39 {offsets = [0, 256], sizes = [8, 128], strides = [1, 1]} : vector<8x512xf32> to vector<8x128xf32>
    %53 = math.tanh %52 : vector<8x128xf32>
    %54 = vector.extract_strided_slice %39 {offsets = [0, 384], sizes = [8, 128], strides = [1, 1]} : vector<8x512xf32> to vector<8x128xf32>
    %55 = arith.negf %54 : vector<8x128xf32>
    %56 = math.exp %55 : vector<8x128xf32>
    %cst_18 = arith.constant 1.000000e+00 : f32
    %57 = vector.broadcast %cst_18 : f32 to vector<8x128xf32>
    %58 = arith.addf %57, %56 : vector<8x128xf32>
    %59 = arith.divf %57, %58 : vector<8x128xf32>
    %60 = arith.mulf %51, %34 : vector<8x128xf32>
    %61 = arith.mulf %45, %53 : vector<8x128xf32>
    %62 = arith.addf %60, %61 : vector<8x128xf32>
    %63 = math.tanh %62 : vector<8x128xf32>
    %64 = arith.mulf %59, %63 : vector<8x128xf32>
    %65 = vector.extract_strided_slice %6 {offsets = [16, 0], sizes = [8, 512], strides = [1, 1]} : vector<64x512xf32> to vector<8x512xf32>
    %cst_19 = arith.constant dense<0.000000e+00> : vector<8x512xf32>
    %66 = tpu.matmul %64, %0, %cst_19 {dimension_numbers = #tpu.dot_dimension_numbers<[1], [0], [0], [1], [0, 0, 1, 1], [], []>} : vector<8x128xf32>, vector<128x512xf32>, vector<8x512xf32> -> vector<8x512xf32>
    %67 = arith.addf %65, %66 : vector<8x512xf32>
    %68 = vector.extract_strided_slice %67 {offsets = [0, 0], sizes = [8, 128], strides = [1, 1]} : vector<8x512xf32> to vector<8x128xf32>
    %69 = arith.negf %68 : vector<8x128xf32>
    %70 = math.exp %69 : vector<8x128xf32>
    %cst_20 = arith.constant 1.000000e+00 : f32
    %71 = vector.broadcast %cst_20 : f32 to vector<8x128xf32>
    %72 = arith.addf %71, %70 : vector<8x128xf32>
    %73 = arith.divf %71, %72 : vector<8x128xf32>
    %74 = vector.extract_strided_slice %67 {offsets = [0, 128], sizes = [8, 128], strides = [1, 1]} : vector<8x512xf32> to vector<8x128xf32>
    %75 = arith.negf %74 : vector<8x128xf32>
    %76 = math.exp %75 : vector<8x128xf32>
    %cst_21 = arith.constant 1.000000e+00 : f32
    %77 = vector.broadcast %cst_21 : f32 to vector<8x128xf32>
    %78 = arith.addf %77, %76 : vector<8x128xf32>
    %79 = arith.divf %77, %78 : vector<8x128xf32>
    %80 = vector.extract_strided_slice %67 {offsets = [0, 256], sizes = [8, 128], strides = [1, 1]} : vector<8x512xf32> to vector<8x128xf32>
    %81 = math.tanh %80 : vector<8x128xf32>
    %82 = vector.extract_strided_slice %67 {offsets = [0, 384], sizes = [8, 128], strides = [1, 1]} : vector<8x512xf32> to vector<8x128xf32>
    %83 = arith.negf %82 : vector<8x128xf32>
    %84 = math.exp %83 : vector<8x128xf32>
    %cst_22 = arith.constant 1.000000e+00 : f32
    %85 = vector.broadcast %cst_22 : f32 to vector<8x128xf32>
    %86 = arith.addf %85, %84 : vector<8x128xf32>
    %87 = arith.divf %85, %86 : vector<8x128xf32>
    %88 = arith.mulf %79, %62 : vector<8x128xf32>
    %89 = arith.mulf %73, %81 : vector<8x128xf32>
    %90 = arith.addf %88, %89 : vector<8x128xf32>
    %91 = math.tanh %90 : vector<8x128xf32>
    %92 = arith.mulf %87, %91 : vector<8x128xf32>
    %93 = vector.extract_strided_slice %6 {offsets = [24, 0], sizes = [8, 512], strides = [1, 1]} : vector<64x512xf32> to vector<8x512xf32>
    %cst_23 = arith.constant dense<0.000000e+00> : vector<8x512xf32>
    %94 = tpu.matmul %92, %0, %cst_23 {dimension_numbers = #tpu.dot_dimension_numbers<[1], [0], [0], [1], [0, 0, 1, 1], [], []>} : vector<8x128xf32>, vector<128x512xf32>, vector<8x512xf32> -> vector<8x512xf32>
    %95 = arith.addf %93, %94 : vector<8x512xf32>
    %96 = vector.extract_strided_slice %95 {offsets = [0, 0], sizes = [8, 128], strides = [1, 1]} : vector<8x512xf32> to vector<8x128xf32>
    %97 = arith.negf %96 : vector<8x128xf32>
    %98 = math.exp %97 : vector<8x128xf32>
    %cst_24 = arith.constant 1.000000e+00 : f32
    %99 = vector.broadcast %cst_24 : f32 to vector<8x128xf32>
    %100 = arith.addf %99, %98 : vector<8x128xf32>
    %101 = arith.divf %99, %100 : vector<8x128xf32>
    %102 = vector.extract_strided_slice %95 {offsets = [0, 128], sizes = [8, 128], strides = [1, 1]} : vector<8x512xf32> to vector<8x128xf32>
    %103 = arith.negf %102 : vector<8x128xf32>
    %104 = math.exp %103 : vector<8x128xf32>
    %cst_25 = arith.constant 1.000000e+00 : f32
    %105 = vector.broadcast %cst_25 : f32 to vector<8x128xf32>
    %106 = arith.addf %105, %104 : vector<8x128xf32>
    %107 = arith.divf %105, %106 : vector<8x128xf32>
    %108 = vector.extract_strided_slice %95 {offsets = [0, 256], sizes = [8, 128], strides = [1, 1]} : vector<8x512xf32> to vector<8x128xf32>
    %109 = math.tanh %108 : vector<8x128xf32>
    %110 = vector.extract_strided_slice %95 {offsets = [0, 384], sizes = [8, 128], strides = [1, 1]} : vector<8x512xf32> to vector<8x128xf32>
    %111 = arith.negf %110 : vector<8x128xf32>
    %112 = math.exp %111 : vector<8x128xf32>
    %cst_26 = arith.constant 1.000000e+00 : f32
    %113 = vector.broadcast %cst_26 : f32 to vector<8x128xf32>
    %114 = arith.addf %113, %112 : vector<8x128xf32>
    %115 = arith.divf %113, %114 : vector<8x128xf32>
    %116 = arith.mulf %107, %90 : vector<8x128xf32>
    %117 = arith.mulf %101, %109 : vector<8x128xf32>
    %118 = arith.addf %116, %117 : vector<8x128xf32>
    %119 = math.tanh %118 : vector<8x128xf32>
    %120 = arith.mulf %115, %119 : vector<8x128xf32>
    %121 = vector.extract_strided_slice %6 {offsets = [32, 0], sizes = [8, 512], strides = [1, 1]} : vector<64x512xf32> to vector<8x512xf32>
    %cst_27 = arith.constant dense<0.000000e+00> : vector<8x512xf32>
    %122 = tpu.matmul %120, %0, %cst_27 {dimension_numbers = #tpu.dot_dimension_numbers<[1], [0], [0], [1], [0, 0, 1, 1], [], []>} : vector<8x128xf32>, vector<128x512xf32>, vector<8x512xf32> -> vector<8x512xf32>
    %123 = arith.addf %121, %122 : vector<8x512xf32>
    %124 = vector.extract_strided_slice %123 {offsets = [0, 0], sizes = [8, 128], strides = [1, 1]} : vector<8x512xf32> to vector<8x128xf32>
    %125 = arith.negf %124 : vector<8x128xf32>
    %126 = math.exp %125 : vector<8x128xf32>
    %cst_28 = arith.constant 1.000000e+00 : f32
    %127 = vector.broadcast %cst_28 : f32 to vector<8x128xf32>
    %128 = arith.addf %127, %126 : vector<8x128xf32>
    %129 = arith.divf %127, %128 : vector<8x128xf32>
    %130 = vector.extract_strided_slice %123 {offsets = [0, 128], sizes = [8, 128], strides = [1, 1]} : vector<8x512xf32> to vector<8x128xf32>
    %131 = arith.negf %130 : vector<8x128xf32>
    %132 = math.exp %131 : vector<8x128xf32>
    %cst_29 = arith.constant 1.000000e+00 : f32
    %133 = vector.broadcast %cst_29 : f32 to vector<8x128xf32>
    %134 = arith.addf %133, %132 : vector<8x128xf32>
    %135 = arith.divf %133, %134 : vector<8x128xf32>
    %136 = vector.extract_strided_slice %123 {offsets = [0, 256], sizes = [8, 128], strides = [1, 1]} : vector<8x512xf32> to vector<8x128xf32>
    %137 = math.tanh %136 : vector<8x128xf32>
    %138 = vector.extract_strided_slice %123 {offsets = [0, 384], sizes = [8, 128], strides = [1, 1]} : vector<8x512xf32> to vector<8x128xf32>
    %139 = arith.negf %138 : vector<8x128xf32>
    %140 = math.exp %139 : vector<8x128xf32>
    %cst_30 = arith.constant 1.000000e+00 : f32
    %141 = vector.broadcast %cst_30 : f32 to vector<8x128xf32>
    %142 = arith.addf %141, %140 : vector<8x128xf32>
    %143 = arith.divf %141, %142 : vector<8x128xf32>
    %144 = arith.mulf %135, %118 : vector<8x128xf32>
    %145 = arith.mulf %129, %137 : vector<8x128xf32>
    %146 = arith.addf %144, %145 : vector<8x128xf32>
    %147 = math.tanh %146 : vector<8x128xf32>
    %148 = arith.mulf %143, %147 : vector<8x128xf32>
    %149 = vector.extract_strided_slice %6 {offsets = [40, 0], sizes = [8, 512], strides = [1, 1]} : vector<64x512xf32> to vector<8x512xf32>
    %cst_31 = arith.constant dense<0.000000e+00> : vector<8x512xf32>
    %150 = tpu.matmul %148, %0, %cst_31 {dimension_numbers = #tpu.dot_dimension_numbers<[1], [0], [0], [1], [0, 0, 1, 1], [], []>} : vector<8x128xf32>, vector<128x512xf32>, vector<8x512xf32> -> vector<8x512xf32>
    %151 = arith.addf %149, %150 : vector<8x512xf32>
    %152 = vector.extract_strided_slice %151 {offsets = [0, 0], sizes = [8, 128], strides = [1, 1]} : vector<8x512xf32> to vector<8x128xf32>
    %153 = arith.negf %152 : vector<8x128xf32>
    %154 = math.exp %153 : vector<8x128xf32>
    %cst_32 = arith.constant 1.000000e+00 : f32
    %155 = vector.broadcast %cst_32 : f32 to vector<8x128xf32>
    %156 = arith.addf %155, %154 : vector<8x128xf32>
    %157 = arith.divf %155, %156 : vector<8x128xf32>
    %158 = vector.extract_strided_slice %151 {offsets = [0, 128], sizes = [8, 128], strides = [1, 1]} : vector<8x512xf32> to vector<8x128xf32>
    %159 = arith.negf %158 : vector<8x128xf32>
    %160 = math.exp %159 : vector<8x128xf32>
    %cst_33 = arith.constant 1.000000e+00 : f32
    %161 = vector.broadcast %cst_33 : f32 to vector<8x128xf32>
    %162 = arith.addf %161, %160 : vector<8x128xf32>
    %163 = arith.divf %161, %162 : vector<8x128xf32>
    %164 = vector.extract_strided_slice %151 {offsets = [0, 256], sizes = [8, 128], strides = [1, 1]} : vector<8x512xf32> to vector<8x128xf32>
    %165 = math.tanh %164 : vector<8x128xf32>
    %166 = vector.extract_strided_slice %151 {offsets = [0, 384], sizes = [8, 128], strides = [1, 1]} : vector<8x512xf32> to vector<8x128xf32>
    %167 = arith.negf %166 : vector<8x128xf32>
    %168 = math.exp %167 : vector<8x128xf32>
    %cst_34 = arith.constant 1.000000e+00 : f32
    %169 = vector.broadcast %cst_34 : f32 to vector<8x128xf32>
    %170 = arith.addf %169, %168 : vector<8x128xf32>
    %171 = arith.divf %169, %170 : vector<8x128xf32>
    %172 = arith.mulf %163, %146 : vector<8x128xf32>
    %173 = arith.mulf %157, %165 : vector<8x128xf32>
    %174 = arith.addf %172, %173 : vector<8x128xf32>
    %175 = math.tanh %174 : vector<8x128xf32>
    %176 = arith.mulf %171, %175 : vector<8x128xf32>
    %177 = vector.extract_strided_slice %6 {offsets = [48, 0], sizes = [8, 512], strides = [1, 1]} : vector<64x512xf32> to vector<8x512xf32>
    %cst_35 = arith.constant dense<0.000000e+00> : vector<8x512xf32>
    %178 = tpu.matmul %176, %0, %cst_35 {dimension_numbers = #tpu.dot_dimension_numbers<[1], [0], [0], [1], [0, 0, 1, 1], [], []>} : vector<8x128xf32>, vector<128x512xf32>, vector<8x512xf32> -> vector<8x512xf32>
    %179 = arith.addf %177, %178 : vector<8x512xf32>
    %180 = vector.extract_strided_slice %179 {offsets = [0, 0], sizes = [8, 128], strides = [1, 1]} : vector<8x512xf32> to vector<8x128xf32>
    %181 = arith.negf %180 : vector<8x128xf32>
    %182 = math.exp %181 : vector<8x128xf32>
    %cst_36 = arith.constant 1.000000e+00 : f32
    %183 = vector.broadcast %cst_36 : f32 to vector<8x128xf32>
    %184 = arith.addf %183, %182 : vector<8x128xf32>
    %185 = arith.divf %183, %184 : vector<8x128xf32>
    %186 = vector.extract_strided_slice %179 {offsets = [0, 128], sizes = [8, 128], strides = [1, 1]} : vector<8x512xf32> to vector<8x128xf32>
    %187 = arith.negf %186 : vector<8x128xf32>
    %188 = math.exp %187 : vector<8x128xf32>
    %cst_37 = arith.constant 1.000000e+00 : f32
    %189 = vector.broadcast %cst_37 : f32 to vector<8x128xf32>
    %190 = arith.addf %189, %188 : vector<8x128xf32>
    %191 = arith.divf %189, %190 : vector<8x128xf32>
    %192 = vector.extract_strided_slice %179 {offsets = [0, 256], sizes = [8, 128], strides = [1, 1]} : vector<8x512xf32> to vector<8x128xf32>
    %193 = math.tanh %192 : vector<8x128xf32>
    %194 = vector.extract_strided_slice %179 {offsets = [0, 384], sizes = [8, 128], strides = [1, 1]} : vector<8x512xf32> to vector<8x128xf32>
    %195 = arith.negf %194 : vector<8x128xf32>
    %196 = math.exp %195 : vector<8x128xf32>
    %cst_38 = arith.constant 1.000000e+00 : f32
    %197 = vector.broadcast %cst_38 : f32 to vector<8x128xf32>
    %198 = arith.addf %197, %196 : vector<8x128xf32>
    %199 = arith.divf %197, %198 : vector<8x128xf32>
    %200 = arith.mulf %191, %174 : vector<8x128xf32>
    %201 = arith.mulf %185, %193 : vector<8x128xf32>
    %202 = arith.addf %200, %201 : vector<8x128xf32>
    %203 = math.tanh %202 : vector<8x128xf32>
    %204 = arith.mulf %199, %203 : vector<8x128xf32>
    %205 = vector.extract_strided_slice %6 {offsets = [56, 0], sizes = [8, 512], strides = [1, 1]} : vector<64x512xf32> to vector<8x512xf32>
    %cst_39 = arith.constant dense<0.000000e+00> : vector<8x512xf32>
    %206 = tpu.matmul %204, %0, %cst_39 {dimension_numbers = #tpu.dot_dimension_numbers<[1], [0], [0], [1], [0, 0, 1, 1], [], []>} : vector<8x128xf32>, vector<128x512xf32>, vector<8x512xf32> -> vector<8x512xf32>
    %207 = arith.addf %205, %206 : vector<8x512xf32>
    %208 = vector.extract_strided_slice %207 {offsets = [0, 0], sizes = [8, 128], strides = [1, 1]} : vector<8x512xf32> to vector<8x128xf32>
    %209 = arith.negf %208 : vector<8x128xf32>
    %210 = math.exp %209 : vector<8x128xf32>
    %cst_40 = arith.constant 1.000000e+00 : f32
    %211 = vector.broadcast %cst_40 : f32 to vector<8x128xf32>
    %212 = arith.addf %211, %210 : vector<8x128xf32>
    %213 = arith.divf %211, %212 : vector<8x128xf32>
    %214 = vector.extract_strided_slice %207 {offsets = [0, 128], sizes = [8, 128], strides = [1, 1]} : vector<8x512xf32> to vector<8x128xf32>
    %215 = arith.negf %214 : vector<8x128xf32>
    %216 = math.exp %215 : vector<8x128xf32>
    %cst_41 = arith.constant 1.000000e+00 : f32
    %217 = vector.broadcast %cst_41 : f32 to vector<8x128xf32>
    %218 = arith.addf %217, %216 : vector<8x128xf32>
    %219 = arith.divf %217, %218 : vector<8x128xf32>
    %220 = vector.extract_strided_slice %207 {offsets = [0, 256], sizes = [8, 128], strides = [1, 1]} : vector<8x512xf32> to vector<8x128xf32>
    %221 = math.tanh %220 : vector<8x128xf32>
    %222 = vector.extract_strided_slice %207 {offsets = [0, 384], sizes = [8, 128], strides = [1, 1]} : vector<8x512xf32> to vector<8x128xf32>
    %223 = arith.negf %222 : vector<8x128xf32>
    %224 = math.exp %223 : vector<8x128xf32>
    %cst_42 = arith.constant 1.000000e+00 : f32
    %225 = vector.broadcast %cst_42 : f32 to vector<8x128xf32>
    %226 = arith.addf %225, %224 : vector<8x128xf32>
    %227 = arith.divf %225, %226 : vector<8x128xf32>
    %228 = arith.mulf %219, %202 : vector<8x128xf32>
    %229 = arith.mulf %213, %221 : vector<8x128xf32>
    %230 = arith.addf %228, %229 : vector<8x128xf32>
    %231 = math.tanh %230 : vector<8x128xf32>
    %232 = arith.mulf %227, %231 : vector<8x128xf32>
    %c0_43 = arith.constant 0 : index
    %c0_44 = arith.constant 0 : index
    %233 = vector.load %arg10[%c0_43, %c0_44] : memref<8x128xf32, #tpu.memory_space<vmem>>, vector<8x128xf32>
    tpu.vector_store %arg10[%c0_43, %c0_44], %232 {strides = array<i32>} : memref<8x128xf32, #tpu.memory_space<vmem>>, vector<8x128xf32>,
    %c0_45 = arith.constant 0 : index
    %c0_46 = arith.constant 0 : index
    %234 = vector.load %arg11[%c0_45, %c0_46] : memref<8x128xf32, #tpu.memory_space<vmem>>, vector<8x128xf32>
    tpu.vector_store %arg11[%c0_45, %c0_46], %230 {strides = array<i32>} : memref<8x128xf32, #tpu.memory_space<vmem>>, vector<8x128xf32>,
    %c0_47 = arith.constant 0 : index
    %c0_48 = arith.constant 0 : index
    %235 = vector.load %arg7[%c0_47, %c0_48] : memref<128x128xf32, #tpu.memory_space<vmem>>, vector<128x128xf32>
    %cst_49 = arith.constant dense<0.000000e+00> : vector<8x128xf32>
    %236 = tpu.matmul %232, %235, %cst_49 {dimension_numbers = #tpu.dot_dimension_numbers<[1], [0], [0], [1], [0, 0, 1, 1], [], []>} : vector<8x128xf32>, vector<128x128xf32>, vector<8x128xf32> -> vector<8x128xf32>
    %c0_50 = arith.constant 0 : index
    %c0_51 = arith.constant 0 : index
    %237 = vector.load %arg8[%c0_50, %c0_51] : memref<1x128xf32, #tpu.memory_space<vmem>>, vector<1x128xf32>
    %238 = vector.broadcast %237 : vector<1x128xf32> to vector<8x128xf32>
    %239 = arith.addf %236, %238 : vector<8x128xf32>
    %c0_52 = arith.constant 0 : index
    %c0_53 = arith.constant 0 : index
    %240 = vector.load %arg9[%c0_52, %c0_53] : memref<8x128xf32, #tpu.memory_space<vmem>>, vector<8x128xf32>
    tpu.vector_store %arg9[%c0_52, %c0_53], %239 {strides = array<i32>} : memref<8x128xf32, #tpu.memory_space<vmem>>, vector<8x128xf32>,
    return
  }
  func.func @transform_0(%arg0: i32) -> (i32, i32) {
    %c0_i32 = arith.constant 0 : i32
    %c0_i32_0 = arith.constant 0 : i32
    %c0_i32_1 = arith.constant 0 : i32
    return %c0_i32, %c0_i32_0 : i32, i32
  }
  func.func @transform_1(%arg0: i32) -> (i32, i32) {
    %c0_i32 = arith.constant 0 : i32
    %c0_i32_0 = arith.constant 0 : i32
    %c0_i32_1 = arith.constant 0 : i32
    return %c0_i32, %c0_i32_0 : i32, i32
  }
  func.func @transform_2(%arg0: i32) -> (i32, i32) {
    %c0_i32 = arith.constant 0 : i32
    %c0_i32_0 = arith.constant 0 : i32
    %c0_i32_1 = arith.constant 0 : i32
    return %c0_i32, %c0_i32_0 : i32, i32
  }
  func.func @transform_3(%arg0: i32) -> (i32, i32) {
    %c0_i32 = arith.constant 0 : i32
    %c0_i32_0 = arith.constant 0 : i32
    %c0_i32_1 = arith.constant 0 : i32
    return %c0_i32, %c0_i32_0 : i32, i32
  }
  func.func @transform_4(%arg0: i32) -> (i32, i32) {
    %c0_i32 = arith.constant 0 : i32
    %c0_i32_0 = arith.constant 0 : i32
    %c0_i32_1 = arith.constant 0 : i32
    return %c0_i32, %c0_i32_0 : i32, i32
  }
  func.func @transform_5(%arg0: i32) -> (i32, i32) {
    %c0_i32 = arith.constant 0 : i32
    %c0_i32_0 = arith.constant 0 : i32
    %c0_i32_1 = arith.constant 0 : i32
    return %c0_i32, %c0_i32_0 : i32, i32
  }
  func.func @transform_6(%arg0: i32) -> (i32, i32) {
    %c0_i32 = arith.constant 0 : i32
    %c0_i32_0 = arith.constant 0 : i32
    %c0_i32_1 = arith.constant 0 : i32
    return %c0_i32, %c0_i32_0 : i32, i32
  }
  func.func @transform_7(%arg0: i32) -> (i32, i32) {
    %c0_i32 = arith.constant 0 : i32
    %c0_i32_0 = arith.constant 0 : i32
    %c0_i32_1 = arith.constant 0 : i32
    return %c0_i32, %c0_i32_0 : i32, i32
  }
  func.func @transform_8(%arg0: i32) -> (i32, i32) {
    %c0_i32 = arith.constant 0 : i32
    %c0_i32_0 = arith.constant 0 : i32
    %c0_i32_1 = arith.constant 0 : i32
    return %c0_i32, %c0_i32_0 : i32, i32
  }
  func.func @transform_9(%arg0: i32) -> (i32, i32) {
    %c0_i32 = arith.constant 0 : i32
    %c0_i32_0 = arith.constant 0 : i32
    %c0_i32_1 = arith.constant 0 : i32
    return %c0_i32, %c0_i32_0 : i32, i32
  }
  func.func @transform_10(%arg0: i32) -> (i32, i32) {
    %c0_i32 = arith.constant 0 : i32
    %c0_i32_0 = arith.constant 0 : i32
    %c0_i32_1 = arith.constant 0 : i32
    return %c0_i32, %c0_i32_0 : i32, i32
  }
}

</mosaic_0001>

<bundles_post_ra>
// kernel: net_forward.1
= control target key start
LH: loop header
LB: loop body
LE: loop exit
PB: predicated region body
PF: predicated region fallthrough
CT: control target
= control target key end

     0   :  { %16 = vsyncpa [#allocation3], 0  ;;  %s2178_s13 = smov [#allocation2]   ;;  %s3659_s0 = inlined_call_operand.vmem [shape: f32[64,8], index: 0, kind: input, shape index: {}]   ;;  %s3660_s1 = inlined_call_operand.vmem [shape: f32[8,128], index: 1, kind: input, shape index: {}]   ;;  %s3661_s2 = inlined_call_operand.vmem [shape: f32[8,128], index: 2, kind: input, shape index: {}]   ;;  %s3662_s3 = inlined_call_operand.vmem [shape: f32[8,512], index: 3, kind: input, shape index: {}]   ;;  %s3663_s4 = inlined_call_operand.vmem [shape: f32[128,512], index: 4, kind: input, shape index: {}]   ;;  %s3664_s5 = inlined_call_operand.vmem [shape: f32[1,512], index: 5, kind: input, shape index: {}]   ;;  %s3665_s6 = inlined_call_operand.hbm [shape: f32[128,128], index: 6, kind: input, shape index: {}]   ;;  %s3666_s7 = inlined_call_operand.vmem [shape: f32[1,128], index: 7, kind: input, shape index: {}]   ;;  %s3667_s8 = inlined_call_operand.vmem [shape: f32[8,128], index: 8, kind: output, shape index: {0}]   ;;  %s3668_s9 = inlined_call_operand.vmem [shape: f32[8,128], index: 9, kind: output, shape index: {1}]   ;;  %s3669_s10 = inlined_call_operand.vmem [shape: f32[8,128], index: 10, kind: output, shape index: {2}]  }
   0x1   :  { %s34_s14 = sshll.u32 %s2178_s13, 4  ;;  %s35_s14 = int_to_ptr.vmem [resolvable:$true] %s34_s14 }
   0x2   :  { %s2164_s15 = scalar_lea.vmem %s35_s14, 2048  ;;  %p2169_p1 = scmp.lt.s32.totalorder %s35_s14, %s35_s14 }
   0x3   :  { %p2165_p0 = scmp.ne.s32.totalorder %s35_s14, %s2164_s15  ;;  %p2170_p2 = scmp.lt.s32.totalorder %s2164_s15, %s2164_s15 }
   0x5   :  { %p2171_p3 = por %p2170_p2, %p2169_p1 }
   0x7   :  { %p2172_p4 = pnand %p2171_p3, %p2165_p0 }
   0x9   :  { %2175 = shalt.err (!%p2172_p4)
}
   0xa   :  { %s2179_s16 = smov 128   ;;  %s2180_s17 = smov 8  }
   0xb   :  { %40 = dma.hbm_to_vmem [thread:$0]  %s3665_s6, 2048, %s35_s14, [#allocation3], %s2179_s16, %s2179_s16, %s2180_s17  }
   0xc   :  { %2176 = dma.done.wait [#allocation3], 2048  }
   0xd   :  { %2177 = vsyncadd [#allocation3], 4294965248  ;;  %v3670_v0 = vmov 0.0   ;;  %v119_v1 = vld [vmem:[%s3662_s3 + $0x8] sm:$0xff]  ;;  %v121_v2 = vld [vmem:[%s3662_s3 + $0x18] sm:$0xff]  ;;  %vm144_vm0 = vcmask 64512  }
   0xe   :  { %233 = vmatprep.mubr.f32.mxu0 %v3670_v0  ;;  %346 = vmatprep.mubr.f32.mxu1 %v3670_v0  ;;  %v118_v3 = vld [vmem:[%s3662_s3] sm:$0xff]  ;;  %v120_v4 = vld [vmem:[%s3662_s3 + $0x10] sm:$0xff]  ;;  %v2261_v6 = vld [vmem:[%s3663_s4 + $0x1e8] sm:$0xff]  ;;  %vm2182_vm1 = vmmov 0  }
   0xf   :  { %199 = vmatprep.subr.mxu0 %v119_v1  ;;  %312 = vmatprep.subr.mxu1 %v121_v2  ;;  %v110_v5 = vld [vmem:[%s3659_s0] sm:$0xff]  ;;  %3758 = vst [vmem:[#allocation5_spill] sm:$0xff] %v2261_v6  ;;  %v2266_v7 = vld [vmem:[%s3663_s4 + $0x1f8] sm:$0xff]  ;;  %v2276_v9 = vld [vmem:[%s3663_s4 + $0x1f0] sm:$0xff] }
  0x10   :  { %200 = vmatpush1.msra.mxu0 %v118_v3  ;;  %313 = vmatpush1.msra.mxu1 %v120_v4  ;;  %3759 = vst [vmem:[#allocation6_spill] sm:$0xff] %v2266_v7  ;;  %v2271_v8 = vld [vmem:[%s3663_s4 + $0x1e0] sm:$0xff]  ;;  %v2283_v10 = vld [vmem:[%s3663_s4 + $0x1c8] sm:$0xff]  ;;  %v2288_v11 = vld [vmem:[%s3663_s4 + $0x1d8] sm:$0xff] }
  0x11   :  { %1866 = vmatmul.mubr.msk.f32.vlgmr.msra.gmra.mxu0 %vm144_vm0, %v110_v5  ;;  %1874 = vmatmul.mubr.msk.f32.vlgmr.msra.gmra.mxu1 %vm144_vm0, %v110_v5  ;;  %v2297_v12 = vld [vmem:[%s3663_s4 + $0x1c0] sm:$0xff]  ;;  %v2302_v13 = vld [vmem:[%s3663_s4 + $0x1d0] sm:$0xff]  ;;  %v111_v14 = vld [vmem:[%s3659_s0 + $0x8] sm:$0xff] }
  0x12   :  { %397 = vmatprep.subr.mxu0 %v2261_v6  ;;  %468 = vmatprep.subr.mxu1 %v2266_v7  ;;  %v2314_v15 = vld [vmem:[%s3663_s4 + $0x1a8] sm:$0xff]  ;;  %v2319_v16 = vld [vmem:[%s3663_s4 + $0x1b8] sm:$0xff]  ;;  %v2326_v17 = vld [vmem:[%s3663_s4 + $0x1a0] sm:$0xff] }
  0x13   :  { %398 = vmatpush1.msra.mxu0 %v2271_v8  ;;  %469 = vmatpush1.msra.mxu1 %v2276_v9  ;;  %v2331_v18 = vld [vmem:[%s3663_s4 + $0x1b0] sm:$0xff]  ;;  %v2338_v19 = vld [vmem:[%s3663_s4 + $0x188] sm:$0xff]  ;;  %v2343_v20 = vld [vmem:[%s3663_s4 + $0x198] sm:$0xff] }
  0x14   :  { %399 = vmatprep.subr.mxu0 %v2283_v10  ;;  %470 = vmatprep.subr.mxu1 %v2288_v11  ;;  %v2352_v21 = vld [vmem:[%s3663_s4 + $0x180] sm:$0xff]  ;;  %v2357_v22 = vld [vmem:[%s3663_s4 + $0x190] sm:$0xff]  ;;  %v2369_v24 = vld [vmem:[%s3663_s4 + $0x168] sm:$0xff] }
  0x15   :  { %239 = vmatprep.mubr.f32.mxu0 %v3670_v0  ;;  %352 = vmatprep.mubr.f32.mxu1 %v3670_v0  ;;  %v112_v23 = vld [vmem:[%s3659_s0 + $0x10] sm:$0xff]  ;;  %v2374_v25 = vld [vmem:[%s3663_s4 + $0x178] sm:$0xff]  ;;  %v2381_v26 = vld [vmem:[%s3663_s4 + $0x160] sm:$0xff] }
  0x16   :  { %400 = vmatpush1.msra.mxu0 %v2297_v12  ;;  %471 = vmatpush1.msra.mxu1 %v2302_v13  ;;  %v2386_v27 = vld [vmem:[%s3663_s4 + $0x170] sm:$0xff]  ;;  %v2393_v28 = vld [vmem:[%s3663_s4 + $0x148] sm:$0xff]  ;;  %v2398_v29 = vld [vmem:[%s3663_s4 + $0x158] sm:$0xff] }
  0x17   :  { %1867 = vmatmul.mubr.msk.f32.gmra.mxu0 %vm144_vm0, %v111_v14  ;;  %1875 = vmatmul.mubr.msk.f32.gmra.mxu1 %vm144_vm0, %v111_v14  ;;  %v2407_v30 = vld [vmem:[%s3663_s4 + $0x140] sm:$0xff]  ;;  %v2412_v31 = vld [vmem:[%s3663_s4 + $0x150] sm:$0xff]  ;;  %v113_v32 = vld [vmem:[%s3659_s0 + $0x18] sm:$0xff] }
  0x18   :  { %401 = vmatprep.subr.mxu0 %v2314_v15  ;;  %472 = vmatprep.subr.mxu1 %v2319_v16  ;;  %v2424_v33 = vld [vmem:[%s3663_s4 + $0x128] sm:$0xff]  ;;  %v2429_v34 = vld [vmem:[%s3663_s4 + $0x138] sm:$0xff]  ;;  %v2436_v35 = vld [vmem:[%s3663_s4 + $0x120] sm:$0xff] }
  0x19   :  { %402 = vmatpush1.msra.mxu0 %v2326_v17  ;;  %473 = vmatpush1.msra.mxu1 %v2331_v18  ;;  %v2441_v36 = vld [vmem:[%s3663_s4 + $0x130] sm:$0xff]  ;;  %v2448_v37 = vld [vmem:[%s3663_s4 + $0x108] sm:$0xff]  ;;  %v2453_v38 = vld [vmem:[%s3663_s4 + $0x118] sm:$0xff] }
  0x1a   :  { %403 = vmatprep.subr.mxu0 %v2338_v19  ;;  %474 = vmatprep.subr.mxu1 %v2343_v20  ;;  %v2462_v39 = vld [vmem:[%s3663_s4 + $0x100] sm:$0xff]  ;;  %v2467_v40 = vld [vmem:[%s3663_s4 + $0x110] sm:$0xff]  ;;  %v2479_v42 = vld [vmem:[%s3663_s4 + $0xe8] sm:$0xff] }
  0x1b   :  { %245 = vmatprep.mubr.f32.mxu0 %v3670_v0  ;;  %358 = vmatprep.mubr.f32.mxu1 %v3670_v0  ;;  %v114_v41 = vld [vmem:[%s3659_s0 + $0x20] sm:$0xff]  ;;  %v2484_v43 = vld [vmem:[%s3663_s4 + $0xf8] sm:$0xff]  ;;  %v2496_v45 = vld [vmem:[%s3663_s4 + $0xf0] sm:$0xff] }
  0x1c   :  { %404 = vmatpush1.msra.mxu0 %v2352_v21  ;;  %475 = vmatpush1.msra.mxu1 %v2357_v22  ;;  %v2491_v44 = vld [vmem:[%s3663_s4 + $0xe0] sm:$0xff]  ;;  %v2503_v46 = vld [vmem:[%s3663_s4 + $0xc8] sm:$0xff]  ;;  %v2508_v47 = vld [vmem:[%s3663_s4 + $0xd8] sm:$0xff] }
  0x1d   :  { %1868 = vmatmul.mubr.msk.f32.gmra.mxu0 %vm144_vm0, %v112_v23  ;;  %1876 = vmatmul.mubr.msk.f32.gmra.mxu1 %vm144_vm0, %v112_v23  ;;  %v2517_v48 = vld [vmem:[%s3663_s4 + $0xc0] sm:$0xff]  ;;  %v2522_v49 = vld [vmem:[%s3663_s4 + $0xd0] sm:$0xff]  ;;  %v115_v50 = vld [vmem:[%s3659_s0 + $0x28] sm:$0xff] }
  0x1e   :  { %405 = vmatprep.subr.mxu0 %v2369_v24  ;;  %476 = vmatprep.subr.mxu1 %v2374_v25  ;;  %v2534_v51 = vld [vmem:[%s3663_s4 + $0xa8] sm:$0xff]  ;;  %v2539_v52 = vld [vmem:[%s3663_s4 + $0xb8] sm:$0xff]  ;;  %v2546_v53 = vld [vmem:[%s3663_s4 + $0xa0] sm:$0xff] }
  0x1f   :  { %406 = vmatpush1.msra.mxu0 %v2381_v26  ;;  %477 = vmatpush1.msra.mxu1 %v2386_v27  ;;  %v2551_v54 = vld [vmem:[%s3663_s4 + $0xb0] sm:$0xff]  ;;  %v2558_v55 = vld [vmem:[%s3663_s4 + $0x88] sm:$0xff]  ;;  %v2563_v56 = vld [vmem:[%s3663_s4 + $0x98] sm:$0xff] }
  0x20   :  { %407 = vmatprep.subr.mxu0 %v2393_v28  ;;  %478 = vmatprep.subr.mxu1 %v2398_v29  ;;  %3760 = vst [vmem:[#allocation7_spill] sm:$0xff] %v2558_v55  ;;  %3761 = vst [vmem:[#allocation8_spill] sm:$0xff] %v2563_v56  ;;  %v2572_v57 = vld [vmem:[%s3663_s4 + $0x80] sm:$0xff]  ;;  %v2577_v58 = vld [vmem:[%s3663_s4 + $0x90] sm:$0xff] }
  0x21   :  { %251 = vmatprep.mubr.f32.mxu0 %v3670_v0  ;;  %364 = vmatprep.mubr.f32.mxu1 %v3670_v0  ;;  %3762 = vst [vmem:[#allocation9_spill] sm:$0xff] %v2572_v57  ;;  %3763 = vst [vmem:[#allocation10_spill] sm:$0xff] %v2577_v58  ;;  %v116_v59 = vld [vmem:[%s3659_s0 + $0x30] sm:$0xff]  ;;  %v2589_v60 = vld [vmem:[%s3663_s4 + $0x68] sm:$0xff] }
  0x22   :  { %408 = vmatpush1.msra.mxu0 %v2407_v30  ;;  %479 = vmatpush1.msra.mxu1 %v2412_v31  ;;  %3764 = vst [vmem:[#allocation11_spill] sm:$0xff] %v2589_v60  ;;  %v2594_v61 = vld [vmem:[%s3663_s4 + $0x78] sm:$0xff]  ;;  %v2601_v62 = vld [vmem:[%s3663_s4 + $0x60] sm:$0xff]  ;;  %v2606_v63 = vld [vmem:[%s3663_s4 + $0x70] sm:$0xff] }
  0x23   :  { %1869 = vmatmul.mubr.msk.f32.gmra.mxu0 %vm144_vm0, %v113_v32  ;;  %1877 = vmatmul.mubr.msk.f32.gmra.mxu1 %vm144_vm0, %v113_v32  ;;  %3765 = vst [vmem:[#allocation12_spill] sm:$0xff] %v2594_v61  ;;  %3766 = vst [vmem:[#allocation13_spill] sm:$0xff] %v2601_v62  ;;  %v2613_v1 = vld [vmem:[%s3663_s4 + $0x48] sm:$0xff]  ;;  %v2618_v2 = vld [vmem:[%s3663_s4 + $0x58] sm:$0xff] }
  0x24   :  { %409 = vmatprep.subr.mxu0 %v2424_v33  ;;  %480 = vmatprep.subr.mxu1 %v2429_v34  ;;  %3767 = vst [vmem:[#allocation14_spill] sm:$0xff] %v2606_v63  ;;  %3768 = vst [vmem:[#allocation15_spill] sm:$0xff] %v2613_v1  ;;  %v2627_v3 = vld [vmem:[%s3663_s4 + $0x40] sm:$0xff]  ;;  %v2632_v4 = vld [vmem:[%s3663_s4 + $0x50] sm:$0xff] }
  0x25   :  { %410 = vmatpush1.msra.mxu0 %v2436_v35  ;;  %481 = vmatpush1.msra.mxu1 %v2441_v36  ;;  %3769 = vst [vmem:[#allocation16_spill] sm:$0xff] %v2618_v2  ;;  %3770 = vst [vmem:[#allocation17_spill] sm:$0xff] %v2627_v3  ;;  %v117_v5 = vld [vmem:[%s3659_s0 + $0x38] sm:$0xff]  ;;  %v2644_v14 = vld [vmem:[%s3663_s4 + $0x28] sm:$0xff] }
  0x26   :  { %411 = vmatprep.subr.mxu0 %v2448_v37  ;;  %482 = vmatprep.subr.mxu1 %v2453_v38  ;;  %3771 = vst [vmem:[#allocation18_spill] sm:$0xff] %v2632_v4  ;;  %3772 = vst [vmem:[#allocation19_spill] sm:$0xff] %v2644_v14  ;;  %v2649_v23 = vld [vmem:[%s3663_s4 + $0x38] sm:$0xff]  ;;  %v2656_v32 = vld [vmem:[%s3663_s4 + $0x20] sm:$0xff] }
  0x27   :  { %257 = vmatprep.mubr.f32.mxu0 %v3670_v0  ;;  %370 = vmatprep.mubr.f32.mxu1 %v3670_v0  ;;  %3773 = vst [vmem:[#allocation20_spill] sm:$0xff] %v2649_v23  ;;  %3774 = vst [vmem:[#allocation21_spill] sm:$0xff] %v2656_v32 }
  0x28   :  { %412 = vmatpush1.msra.mxu0 %v2462_v39  ;;  %483 = vmatpush1.msra.mxu1 %v2467_v40 }
  0x29   :  { %1870 = vmatmul.mubr.msk.f32.gmra.mxu0 %vm144_vm0, %v114_v41  ;;  %1878 = vmatmul.mubr.msk.f32.gmra.mxu1 %vm144_vm0, %v114_v41  ;;  %v2661_v41 = vld [vmem:[%s3663_s4 + $0x30] sm:$0xff] }
  0x2a   :  { %413 = vmatprep.subr.mxu0 %v2479_v42  ;;  %484 = vmatprep.subr.mxu1 %v2484_v43  ;;  %3775 = vst [vmem:[#allocation22_spill] sm:$0xff] %v2661_v41 }
  0x2b   :  { %414 = vmatpush1.msra.mxu0 %v2491_v44  ;;  %485 = vmatpush1.msra.mxu1 %v2496_v45 }
  0x2c   :  { %415 = vmatprep.subr.mxu0 %v2503_v46  ;;  %486 = vmatprep.subr.mxu1 %v2508_v47 }
  0x2d   :  { %263 = vmatprep.mubr.f32.mxu0 %v3670_v0  ;;  %376 = vmatprep.mubr.f32.mxu1 %v3670_v0 }
  0x2e   :  { %416 = vmatpush1.msra.mxu0 %v2517_v48  ;;  %487 = vmatpush1.msra.mxu1 %v2522_v49 }
  0x2f   :  { %1871 = vmatmul.mubr.msk.f32.gmra.mxu0 %vm144_vm0, %v115_v50  ;;  %1879 = vmatmul.mubr.msk.f32.gmra.mxu1 %vm144_vm0, %v115_v50  ;;  %v2668_v50 = vld [vmem:[%s3663_s4 + $0x8] sm:$0xff] }
  0x30   :  { %417 = vmatprep.subr.mxu0 %v2534_v51  ;;  %488 = vmatprep.subr.mxu1 %v2539_v52  ;;  %3776 = vst [vmem:[#allocation23_spill] sm:$0xff] %v2668_v50 }
  0x31   :  { %418 = vmatpush1.msra.mxu0 %v2546_v53  ;;  %489 = vmatpush1.msra.mxu1 %v2551_v54 }
  0x32   :  { %419 = vmatprep.subr.mxu0 %v2558_v55  ;;  %490 = vmatprep.subr.mxu1 %v2563_v56 }
  0x33   :  { %269 = vmatprep.mubr.f32.mxu0 %v3670_v0  ;;  %382 = vmatprep.mubr.f32.mxu1 %v3670_v0 }
  0x34   :  { %420 = vmatpush1.msra.mxu0 %v2572_v57  ;;  %491 = vmatpush1.msra.mxu1 %v2577_v58 }
  0x35   :  { %1872 = vmatmul.mubr.msk.f32.gmra.mxu0 %vm144_vm0, %v116_v59  ;;  %1880 = vmatmul.mubr.msk.f32.gmra.mxu1 %vm144_vm0, %v116_v59  ;;  %v2673_v59 = vld [vmem:[%s3663_s4 + $0x18] sm:$0xff] }
  0x36   :  { %421 = vmatprep.subr.mxu0 %v2589_v60  ;;  %492 = vmatprep.subr.mxu1 %v2594_v61  ;;  %3777 = vst [vmem:[#allocation24_spill] sm:$0xff] %v2673_v59 }
  0x37   :  { %422 = vmatpush1.msra.mxu0 %v2601_v62  ;;  %493 = vmatpush1.msra.mxu1 %v2606_v63 }
  0x38   :  { %423 = vmatprep.subr.mxu0 %v2613_v1  ;;  %494 = vmatprep.subr.mxu1 %v2618_v2 }
  0x39   :  { %275 = vmatprep.mubr.f32.mxu0 %v3670_v0  ;;  %388 = vmatprep.mubr.f32.mxu1 %v3670_v0  ;;  %v2680_v0 = vld [vmem:[%s3663_s4] sm:$0xff] }
  0x3a   :  { %424 = vmatpush1.msra.mxu0 %v2627_v3  ;;  %495 = vmatpush1.msra.mxu1 %v2632_v4  ;;  %3778 = vst [vmem:[#allocation25_spill] sm:$0xff] %v2680_v0 }
  0x3b   :  { %1873 = vmatmul.mubr.msk.f32.gmra.mxu0 %vm144_vm0, %v117_v5  ;;  %1881 = vmatmul.mubr.msk.f32.gmra.mxu1 %vm144_vm0, %v117_v5  ;;  %v2687_v5 = vld [vmem:[%s3663_s4 + $0x10] sm:$0xff] }
  0x3c   :  { %425 = vmatprep.subr.mxu0 %v2644_v14  ;;  %496 = vmatprep.subr.mxu1 %v2649_v23  ;;  %3779 = vst [vmem:[#allocation26_spill] sm:$0xff] %v2687_v5  ;;  %v395_v23 = vld [vmem:[%s3660_s1] sm:$0xff]  ;;  %v3780_v14 = vmov 0.0  }
  0x3d   :  { %426 = vmatpush1.msra.mxu0 %v2656_v32  ;;  %497 = vmatpush1.msra.mxu1 %v2661_v41 }
  0x3e   :  { %427 = vmatprep.subr.mxu0 %v2668_v50  ;;  %498 = vmatprep.subr.mxu1 %v2673_v59 }
  0x3f   :  { %428 = vmatpush1.msra.mxu0 %v2680_v0  ;;  %461 = vmatprep.mubr.f32.mxu0 %v3780_v14 }
  0x40   :  { %499 = vmatpush1.msra.mxu1 %v2687_v5  ;;  %532 = vmatprep.mubr.f32.mxu1 %v3780_v14 }
  0x41   :  { %462 = vmatmul.mubr.f32.vlgmr.msra.gmra.mxu0 %v395_v23  ;;  %533 = vmatmul.mubr.f32.vlgmr.msra.gmra.mxu1 %v395_v23  ;;  %v3781_v23 = vld [vmem:[#allocation19_spill] sm:$0xff] }
  0x42   :  { %567 = vmatprep.subr.mxu0 %v2261_v6  ;;  %638 = vmatprep.subr.mxu1 %v2266_v7 }
  0x43   :  { %568 = vmatpush1.msra.mxu0 %v2271_v8  ;;  %639 = vmatpush1.msra.mxu1 %v2276_v9 }
  0x44   :  { %569 = vmatprep.subr.mxu0 %v2283_v10  ;;  %640 = vmatprep.subr.mxu1 %v2288_v11 }
  0x45   :  { %570 = vmatpush1.msra.mxu0 %v2297_v12  ;;  %641 = vmatpush1.msra.mxu1 %v2302_v13 }
  0x46   :  { %571 = vmatprep.subr.mxu0 %v2314_v15  ;;  %642 = vmatprep.subr.mxu1 %v2319_v16 }
  0x47   :  { %572 = vmatpush1.msra.mxu0 %v2326_v17  ;;  %643 = vmatpush1.msra.mxu1 %v2331_v18 }
  0x48   :  { %573 = vmatprep.subr.mxu0 %v2338_v19  ;;  %644 = vmatprep.subr.mxu1 %v2343_v20 }
  0x49   :  { %574 = vmatpush1.msra.mxu0 %v2352_v21  ;;  %645 = vmatpush1.msra.mxu1 %v2357_v22 }
  0x4a   :  { %575 = vmatprep.subr.mxu0 %v2369_v24  ;;  %646 = vmatprep.subr.mxu1 %v2374_v25 }
  0x4b   :  { %576 = vmatpush1.msra.mxu0 %v2381_v26  ;;  %647 = vmatpush1.msra.mxu1 %v2386_v27 }
  0x4c   :  { %577 = vmatprep.subr.mxu0 %v2393_v28  ;;  %648 = vmatprep.subr.mxu1 %v2398_v29 }
  0x4d   :  { %578 = vmatpush1.msra.mxu0 %v2407_v30  ;;  %649 = vmatpush1.msra.mxu1 %v2412_v31 }
  0x4e   :  { %579 = vmatprep.subr.mxu0 %v2424_v33  ;;  %650 = vmatprep.subr.mxu1 %v2429_v34 }
  0x4f   :  { %580 = vmatpush1.msra.mxu0 %v2436_v35  ;;  %651 = vmatpush1.msra.mxu1 %v2441_v36 }
  0x50   :  { %581 = vmatprep.subr.mxu0 %v2448_v37  ;;  %652 = vmatprep.subr.mxu1 %v2453_v38 }
  0x51   :  { %582 = vmatpush1.msra.mxu0 %v2462_v39  ;;  %653 = vmatpush1.msra.mxu1 %v2467_v40 }
  0x52   :  { %583 = vmatprep.subr.mxu0 %v2479_v42  ;;  %654 = vmatprep.subr.mxu1 %v2484_v43 }
  0x53   :  { %584 = vmatpush1.msra.mxu0 %v2491_v44  ;;  %655 = vmatpush1.msra.mxu1 %v2496_v45 }
  0x54   :  { %585 = vmatprep.subr.mxu0 %v2503_v46  ;;  %656 = vmatprep.subr.mxu1 %v2508_v47 }
  0x55   :  { %586 = vmatpush1.msra.mxu0 %v2517_v48  ;;  %657 = vmatpush1.msra.mxu1 %v2522_v49 }
  0x56   :  { %587 = vmatprep.subr.mxu0 %v2534_v51  ;;  %658 = vmatprep.subr.mxu1 %v2539_v52 }
  0x57   :  { %588 = vmatpush1.msra.mxu0 %v2546_v53  ;;  %659 = vmatpush1.msra.mxu1 %v2551_v54 }
  0x58   :  { %589 = vmatprep.subr.mxu0 %v2558_v55  ;;  %660 = vmatprep.subr.mxu1 %v2563_v56 }
  0x59   :  { %590 = vmatpush1.msra.mxu0 %v2572_v57  ;;  %661 = vmatpush1.msra.mxu1 %v2577_v58  ;;  %v3782_v57 = vld [vmem:[#allocation20_spill] sm:$0xff] }
  0x5a   :  { %591 = vmatprep.subr.mxu0 %v2589_v60  ;;  %662 = vmatprep.subr.mxu1 %v2594_v61 }
  0x5b   :  { %592 = vmatpush1.msra.mxu0 %v2601_v62  ;;  %663 = vmatpush1.msra.mxu1 %v2606_v63 }
  0x5c   :  { %593 = vmatprep.subr.mxu0 %v2613_v1  ;;  %664 = vmatprep.subr.mxu1 %v2618_v2 }
  0x5d   :  { %594 = vmatpush1.msra.mxu0 %v2627_v3  ;;  %665 = vmatpush1.msra.mxu1 %v2632_v4 }
  0x5e   :  { %595 = vmatprep.subr.mxu0 %v3781_v23  ;;  %666 = vmatprep.subr.mxu1 %v3782_v57  ;;  %v124_v57 = vlaneseq }
  0x5f   :  { %596 = vmatpush1.msra.mxu0 %v2656_v32  ;;  %667 = vmatpush1.msra.mxu1 %v2661_v41 }
  0x60   :  { %597 = vmatprep.subr.mxu0 %v2668_v50  ;;  %668 = vmatprep.subr.mxu1 %v2673_v59  ;;  %v125_v32 = vshrl.u32 %v124_v57, 7 }
  0x61   :  { %598 = vmatpush1.msra.mxu0 %v2680_v0  ;;  %631 = vmatprep.mubr.f32.mxu0 %v3780_v14  ;;  %v122_v0 = vld [vmem:[%s3664_s5] sm:$0xf] }
  0x62   :  { %669 = vmatpush1.msra.mxu1 %v2687_v5  ;;  %702 = vmatprep.mubr.f32.mxu1 %v3780_v14  ;;  %v126_v50 = vsub.s32 0, %v125_v32  ;;  %v134_v59 = vsub.s32 2, %v125_v32  ;;  %v130_v14 = vsub.s32 1, %v125_v32 }
  0x63   :  { %737 = vmatprep.subr.mxu0 %v2261_v6  ;;  %808 = vmatprep.subr.mxu1 %v2266_v7  ;;  %v138_v6 = vsub.s32 3, %v125_v32 }
  0x64   :  { %v127_v3 = vrot.slane %v122_v0, %v126_v50  ;;  %v2777_v7 = vrot.slane %v122_v0, %v134_v59  ;;  %v131_v1 = vrot.slane %v122_v0, %v130_v14 }
  0x65   :  { %v2779_v63 = vrot.slane %v122_v0, %v138_v6 }
  0xd1   :  { %v2766_v23 = vpop.f32.mrf.mxu0  ;;  %v2768_v41 = vpop.f32.mrf.mxu1 }
  0xd3   :  { %v2773_v4 = vpop.f32.mrf.mxu0  ;;  %v2775_v5 = vpop.f32.mrf.mxu1 }
  0xd7   :  { %v241_v57 = vpop.f32.mrf.mxu0  ;;  %v354_v2 = vpop.f32.mrf.mxu1 }
  0xd8   :  { %v2781_v62 = vadd.f32 %v241_v57, %v127_v3  ;;  %v2784_v61 = vadd.f32 %v354_v2, %v2777_v7 }
  0xd9   :  { %v243_v60 = vpop.f32.mrf.mxu0  ;;  %v356_v58 = vpop.f32.mrf.mxu1 }
  0xda   :  { %3783 = vst [vmem:[#allocation27_spill] sm:$0xff] %v2781_v62  ;;  %3784 = vst [vmem:[#allocation28_spill] sm:$0xff] %v2784_v61  ;;  %v2786_v56 = vadd.f32 %v243_v60, %v131_v1  ;;  %v2789_v55 = vadd.f32 %v356_v58, %v2779_v63 }
  0xdc   :  { %3785 = vst [vmem:[#allocation29_spill] sm:$0xff] %v2786_v56  ;;  %3786 = vst [vmem:[#allocation30_spill] sm:$0xff] %v2789_v55 }
  0xdd   :  { %v247_v32 = vpop.f32.mrf.mxu0  ;;  %v360_v50 = vpop.f32.mrf.mxu1 }
  0xde   :  { %v2791_v59 = vadd.f32 %v247_v32, %v127_v3  ;;  %v2794_v14 = vadd.f32 %v360_v50, %v2777_v7 }
  0xdf   :  { %v249_v0 = vpop.f32.mrf.mxu0  ;;  %v362_v6 = vpop.f32.mrf.mxu1 }
  0xe0   :  { %3787 = vst [vmem:[#allocation31_spill] sm:$0xff] %v2791_v59  ;;  %3788 = vst [vmem:[#allocation32_spill] sm:$0xff] %v2794_v14  ;;  %v2796_v57 = vadd.f32 %v249_v0, %v131_v1  ;;  %v2799_v2 = vadd.f32 %v362_v6, %v2779_v63 }
  0xe2   :  { %3789 = vst [vmem:[#allocation33_spill] sm:$0xff] %v2796_v57  ;;  %3790 = vst [vmem:[#allocation34_spill] sm:$0xff] %v2799_v2 }
  0xe3   :  { %v253_v61 = vpop.f32.mrf.mxu0  ;;  %v366_v60 = vpop.f32.mrf.mxu1 }
  0xe4   :  { %v2801_v56 = vadd.f32 %v253_v61, %v127_v3  ;;  %v2804_v58 = vadd.f32 %v366_v60, %v2777_v7 }
  0xe5   :  { %v255_v55 = vpop.f32.mrf.mxu0  ;;  %v368_v32 = vpop.f32.mrf.mxu1 }
  0xe6   :  { %3791 = vst [vmem:[#allocation35_spill] sm:$0xff] %v2801_v56  ;;  %3792 = vst [vmem:[#allocation36_spill] sm:$0xff] %v2804_v58  ;;  %v2806_v59 = vadd.f32 %v255_v55, %v131_v1  ;;  %v2809_v50 = vadd.f32 %v368_v32, %v2779_v63 }
  0xe8   :  { %3793 = vst [vmem:[#allocation37_spill] sm:$0xff] %v2806_v59  ;;  %3794 = vst [vmem:[#allocation38_spill] sm:$0xff] %v2809_v50 }
  0xe9   :  { %v259_v14 = vpop.f32.mrf.mxu0  ;;  %v372_v0 = vpop.f32.mrf.mxu1 }
  0xea   :  { %v2811_v57 = vadd.f32 %v259_v14, %v127_v3  ;;  %v2814_v6 = vadd.f32 %v372_v0, %v2777_v7 }
  0xeb   :  { %v261_v2 = vpop.f32.mrf.mxu0  ;;  %v374_v61 = vpop.f32.mrf.mxu1 }
  0xec   :  { %3795 = vst [vmem:[#allocation39_spill] sm:$0xff] %v2811_v57  ;;  %3796 = vst [vmem:[#allocation40_spill] sm:$0xff] %v2814_v6  ;;  %v2816_v56 = vadd.f32 %v261_v2, %v131_v1  ;;  %v2819_v60 = vadd.f32 %v374_v61, %v2779_v63 }
  0xee   :  { %3797 = vst [vmem:[#allocation41_spill] sm:$0xff] %v2816_v56  ;;  %3798 = vst [vmem:[#allocation42_spill] sm:$0xff] %v2819_v60 }
  0xef   :  { %v265_v58 = vpop.f32.mrf.mxu0  ;;  %v378_v55 = vpop.f32.mrf.mxu1 }
  0xf0   :  { %v2821_v59 = vadd.f32 %v265_v58, %v127_v3  ;;  %v2824_v32 = vadd.f32 %v378_v55, %v2777_v7 }
  0xf1   :  { %v267_v50 = vpop.f32.mrf.mxu0  ;;  %v380_v14 = vpop.f32.mrf.mxu1 }
  0xf2   :  { %3799 = vst [vmem:[#allocation43_spill] sm:$0xff] %v2821_v59  ;;  %3800 = vst [vmem:[#allocation44_spill] sm:$0xff] %v2824_v32  ;;  %v2826_v57 = vadd.f32 %v267_v50, %v131_v1  ;;  %v2829_v0 = vadd.f32 %v380_v14, %v2779_v63 }
  0xf4   :  { %3801 = vst [vmem:[#allocation45_spill] sm:$0xff] %v2826_v57  ;;  %3802 = vst [vmem:[#allocation46_spill] sm:$0xff] %v2829_v0 }
  0xf5   :  { %v271_v6 = vpop.f32.mrf.mxu0  ;;  %v384_v2 = vpop.f32.mrf.mxu1 }
  0xf6   :  { %v2831_v56 = vadd.f32 %v271_v6, %v127_v3  ;;  %v2834_v61 = vadd.f32 %v384_v2, %v2777_v7 }
  0xf7   :  { %v273_v60 = vpop.f32.mrf.mxu0  ;;  %v386_v58 = vpop.f32.mrf.mxu1 }
  0xf8   :  { %3803 = vst [vmem:[#allocation47_spill] sm:$0xff] %v2831_v56  ;;  %3804 = vst [vmem:[#allocation48_spill] sm:$0xff] %v2834_v61  ;;  %v2836_v59 = vadd.f32 %v273_v60, %v131_v1  ;;  %v2839_v55 = vadd.f32 %v386_v58, %v2779_v63  ;;  %v236_v60 = vadd.f32 %v2766_v23, %v127_v3 }
  0xf9   :  { %v238_v58 = vadd.f32 %v2773_v4, %v131_v1 }
  0xfa   :  { %3805 = vst [vmem:[#allocation49_spill] sm:$0xff] %v2836_v59  ;;  %3806 = vst [vmem:[#allocation50_spill] sm:$0xff] %v2839_v55 }
  0xfb   :  { %v277_v32 = vpop.f32.mrf.mxu0  ;;  %v390_v50 = vpop.f32.mrf.mxu1 }
  0xfc   :  { %v2841_v57 = vadd.f32 %v277_v32, %v127_v3  ;;  %v2844_v14 = vadd.f32 %v390_v50, %v2777_v7 }
  0xfd   :  { %v279_v0 = vpop.f32.mrf.mxu0  ;;  %v392_v6 = vpop.f32.mrf.mxu1 }
  0xfe   :  { %3807 = vst [vmem:[#allocation51_spill] sm:$0xff] %v2841_v57  ;;  %3808 = vst [vmem:[#allocation52_spill] sm:$0xff] %v2844_v14  ;;  %v2846_v56 = vadd.f32 %v279_v0, %v131_v1  ;;  %v2849_v2 = vadd.f32 %v392_v6, %v2779_v63  ;;  %v351_v0 = vadd.f32 %v2775_v5, %v2779_v63  ;;  %v396_v63 = vld [vmem:[%s3661_s2] sm:$0xff] }
  0xff   :  { %v349_v6 = vadd.f32 %v2768_v41, %v2777_v7 }
 0x100   :  { %3809 = vst [vmem:[#allocation53_spill] sm:$0xff] %v2846_v56  ;;  %3810 = vst [vmem:[#allocation54_spill] sm:$0xff] %v2849_v2 }
 0x101   :  { %v463_v61 = vpop.f32.mrf.mxu0  ;;  %v534_v57 = vpop.f32.mrf.mxu1 }
 0x102   :  { %v539_v55 = vadd.f32 %v463_v61, %v236_v60  ;;  %v541_v2 = vadd.f32 %v534_v57, %v349_v6  ;;  %v3815_v6 = vld [vmem:[#allocation11_spill] sm:$0xff] }
 0x103   :  { %v465_v59 = vpop.f32.mrf.mxu0  ;;  %v536_v14 = vpop.f32.mrf.mxu1 }
 0x104   :  { %v1882_v62 = vmul.f32 -1.442695, %v539_v55  ;;  %v540_v32 = vadd.f32 %v465_v59, %v238_v58  ;;  %v542_v56 = vadd.f32 %v536_v14, %v351_v0  ;;  %v3811_v58 = vld [vmem:[#allocation7_spill] sm:$0xff]  ;;  %v3814_v0 = vld [vmem:[#allocation10_spill] sm:$0xff] }
 0x106   :  { %1964 = vpow2.f32 %v1882_v62  ;;  %v1883_v50 = vmul.f32 -1.442695, %v540_v32  ;;  %v1884_v3 = vmul.f32 -1.442695, %v542_v56  ;;  %v3812_v32 = vld [vmem:[#allocation8_spill] sm:$0xff] }
 0x108   :  { %1966 = vpow2.f32 %v1883_v50  ;;  %v3813_v50 = vld [vmem:[#allocation9_spill] sm:$0xff] }
 0x109   :  { %1968 = vpow2.f32 %v1884_v3  ;;  %v3816_v3 = vld [vmem:[#allocation12_spill] sm:$0xff] }
 0x113   :  { %v1965_v23 = vpop.eup %1964 }
 0x114   :  { %v546_v1 = vadd.f32 1.0, %v1965_v23  ;;  %v3817_v23 = vld [vmem:[#allocation13_spill] sm:$0xff] }
 0x115   :  { %v1967_v4 = vpop.eup %1966 }
 0x116   :  { %1970 = vrcp.f32 %v546_v1  ;;  %v552_v59 = vadd.f32 1.0, %v1967_v4  ;;  %v1969_v62 = vpop.eup %1968  ;;  %v3818_v1 = vld [vmem:[#allocation14_spill] sm:$0xff]  ;;  %v3819_v4 = vld [vmem:[#allocation15_spill] sm:$0xff] }
 0x117   :  { %1972 = vtanh.f32 %v541_v2  ;;  %v559_v14 = vadd.f32 1.0, %v1969_v62  ;;  %v3821_v62 = vld [vmem:[#allocation17_spill] sm:$0xff] }
 0x118   :  { %1974 = vrcp.f32 %v552_v59  ;;  %v3820_v59 = vld [vmem:[#allocation16_spill] sm:$0xff] }
 0x119   :  { %1976 = vrcp.f32 %v559_v14  ;;  %v3826_v14 = vld [vmem:[#allocation22_spill] sm:$0xff] }
 0x123   :  { %v1971_v61 = vpop.eup %1970 }
 0x124   :  { %v1973_v5 = vpop.eup %1972 }
 0x125   :  { %v1975_v55 = vpop.eup %1974  ;;  %v563_v7 = vmul.f32 %v1973_v5, %v1971_v61  ;;  %v3822_v61 = vld [vmem:[#allocation18_spill] sm:$0xff]  ;;  %v3824_v5 = vld [vmem:[#allocation20_spill] sm:$0xff] }
 0x126   :  { %v562_v56 = vmul.f32 %v1975_v55, %v396_v63  ;;  %v1977_v57 = vpop.eup %1976  ;;  %v3823_v63 = vld [vmem:[#allocation19_spill] sm:$0xff]  ;;  %v3825_v55 = vld [vmem:[#allocation21_spill] sm:$0xff] }
 0x128   :  { %v2860_v41 = vadd.f32 %v563_v7, %v562_v56  ;;  %v3827_v7 = vld [vmem:[#allocation23_spill] sm:$0xff]  ;;  %v3828_v56 = vld [vmem:[#allocation24_spill] sm:$0xff] }
 0x12a   :  { %1978 = vtanh.f32 %v2860_v41 }
 0x137   :  { %v1979_v60 = vpop.eup %1978 }
 0x138   :  { %v566_v2 = vmul.f32 %v1979_v60, %v1977_v57  ;;  %v3829_v57 = vld [vmem:[#allocation25_spill] sm:$0xff]  ;;  %v3830_v60 = vmov 0.0  }
 0x13a   :  { %632 = vmatmul.mubr.f32.vlgmr.msra.gmra.mxu0 %v566_v2  ;;  %703 = vmatmul.mubr.f32.vlgmr.msra.gmra.mxu1 %v566_v2  ;;  %v3831_v2 = vld [vmem:[#allocation26_spill] sm:$0xff] }
 0x13b   :  { %738 = vmatpush1.msra.mxu0 %v2271_v8  ;;  %809 = vmatpush1.msra.mxu1 %v2276_v9 }
 0x13c   :  { %739 = vmatprep.subr.mxu0 %v2283_v10  ;;  %810 = vmatprep.subr.mxu1 %v2288_v11 }
 0x13d   :  { %740 = vmatpush1.msra.mxu0 %v2297_v12  ;;  %811 = vmatpush1.msra.mxu1 %v2302_v13 }
 0x13e   :  { %741 = vmatprep.subr.mxu0 %v2314_v15  ;;  %812 = vmatprep.subr.mxu1 %v2319_v16 }
 0x13f   :  { %742 = vmatpush1.msra.mxu0 %v2326_v17  ;;  %813 = vmatpush1.msra.mxu1 %v2331_v18 }
 0x140   :  { %743 = vmatprep.subr.mxu0 %v2338_v19  ;;  %814 = vmatprep.subr.mxu1 %v2343_v20 }
 0x141   :  { %744 = vmatpush1.msra.mxu0 %v2352_v21  ;;  %815 = vmatpush1.msra.mxu1 %v2357_v22 }
 0x142   :  { %745 = vmatprep.subr.mxu0 %v2369_v24  ;;  %816 = vmatprep.subr.mxu1 %v2374_v25 }
 0x143   :  { %746 = vmatpush1.msra.mxu0 %v2381_v26  ;;  %817 = vmatpush1.msra.mxu1 %v2386_v27 }
 0x144   :  { %747 = vmatprep.subr.mxu0 %v2393_v28  ;;  %818 = vmatprep.subr.mxu1 %v2398_v29 }
 0x145   :  { %748 = vmatpush1.msra.mxu0 %v2407_v30  ;;  %819 = vmatpush1.msra.mxu1 %v2412_v31 }
 0x146   :  { %749 = vmatprep.subr.mxu0 %v2424_v33  ;;  %820 = vmatprep.subr.mxu1 %v2429_v34 }
 0x147   :  { %750 = vmatpush1.msra.mxu0 %v2436_v35  ;;  %821 = vmatpush1.msra.mxu1 %v2441_v36 }
 0x148   :  { %751 = vmatprep.subr.mxu0 %v2448_v37  ;;  %822 = vmatprep.subr.mxu1 %v2453_v38 }
 0x149   :  { %752 = vmatpush1.msra.mxu0 %v2462_v39  ;;  %823 = vmatpush1.msra.mxu1 %v2467_v40 }
 0x14a   :  { %753 = vmatprep.subr.mxu0 %v2479_v42  ;;  %824 = vmatprep.subr.mxu1 %v2484_v43 }
 0x14b   :  { %754 = vmatpush1.msra.mxu0 %v2491_v44  ;;  %825 = vmatpush1.msra.mxu1 %v2496_v45 }
 0x14c   :  { %755 = vmatprep.subr.mxu0 %v2503_v46  ;;  %826 = vmatprep.subr.mxu1 %v2508_v47 }
 0x14d   :  { %756 = vmatpush1.msra.mxu0 %v2517_v48  ;;  %827 = vmatpush1.msra.mxu1 %v2522_v49 }
 0x14e   :  { %757 = vmatprep.subr.mxu0 %v2534_v51  ;;  %828 = vmatprep.subr.mxu1 %v2539_v52 }
 0x14f   :  { %758 = vmatpush1.msra.mxu0 %v2546_v53  ;;  %829 = vmatpush1.msra.mxu1 %v2551_v54 }
 0x150   :  { %759 = vmatprep.subr.mxu0 %v3811_v58  ;;  %830 = vmatprep.subr.mxu1 %v3812_v32 }
 0x151   :  { %760 = vmatpush1.msra.mxu0 %v3813_v50  ;;  %831 = vmatpush1.msra.mxu1 %v3814_v0 }
 0x152   :  { %761 = vmatprep.subr.mxu0 %v3815_v6  ;;  %832 = vmatprep.subr.mxu1 %v3816_v3  ;;  %v3837_v3 = vld [vmem:[#allocation28_spill] sm:$0xff] }
 0x153   :  { %762 = vmatpush1.msra.mxu0 %v3817_v23  ;;  %833 = vmatpush1.msra.mxu1 %v3818_v1  ;;  %v3836_v23 = vld [vmem:[#allocation30_spill] sm:$0xff] }
 0x154   :  { %763 = vmatprep.subr.mxu0 %v3819_v4  ;;  %834 = vmatprep.subr.mxu1 %v3820_v59 }
 0x155   :  { %764 = vmatpush1.msra.mxu0 %v3821_v62  ;;  %835 = vmatpush1.msra.mxu1 %v3822_v61  ;;  %v3832_v61 = vld [vmem:[#allocation5_spill] sm:$0xff] }
 0x156   :  { %765 = vmatprep.subr.mxu0 %v3823_v63  ;;  %836 = vmatprep.subr.mxu1 %v3824_v5  ;;  %v3833_v63 = vld [vmem:[#allocation6_spill] sm:$0xff] }
 0x157   :  { %766 = vmatpush1.msra.mxu0 %v3825_v55  ;;  %837 = vmatpush1.msra.mxu1 %v3826_v14  ;;  %v3834_v55 = vld [vmem:[#allocation27_spill] sm:$0xff] }
 0x158   :  { %767 = vmatprep.subr.mxu0 %v3827_v7  ;;  %838 = vmatprep.subr.mxu1 %v3828_v56  ;;  %v3835_v7 = vld [vmem:[#allocation29_spill] sm:$0xff] }
 0x159   :  { %768 = vmatpush1.msra.mxu0 %v3829_v57  ;;  %801 = vmatprep.mubr.f32.mxu0 %v3830_v60 }
 0x15a   :  { %839 = vmatpush1.msra.mxu1 %v3831_v2  ;;  %872 = vmatprep.mubr.f32.mxu1 %v3830_v60 }
 0x15b   :  { %907 = vmatprep.subr.mxu0 %v3832_v61  ;;  %978 = vmatprep.subr.mxu1 %v3833_v63 }
 0x1fa   :  { %v633_v5 = vpop.f32.mrf.mxu0  ;;  %v704_v56 = vpop.f32.mrf.mxu1 }
 0x1fb   :  { %v709_v62 = vadd.f32 %v633_v5, %v3834_v55  ;;  %v711_v60 = vadd.f32 %v704_v56, %v3837_v3 }
 0x1fc   :  { %v635_v14 = vpop.f32.mrf.mxu0  ;;  %v706_v1 = vpop.f32.mrf.mxu1 }
 0x1fd   :  { %v1885_v59 = vmul.f32 -1.442695, %v709_v62  ;;  %v710_v4 = vadd.f32 %v635_v14, %v3835_v7  ;;  %v712_v2 = vadd.f32 %v706_v1, %v3836_v23 }
 0x1ff   :  { %1980 = vpow2.f32 %v1885_v59  ;;  %v1886_v57 = vmul.f32 -1.442695, %v710_v4  ;;  %v1887_v6 = vmul.f32 -1.442695, %v712_v2  ;;  %v3860_v2 = vld [vmem:[#allocation34_spill] sm:$0xff] }
 0x201   :  { %1982 = vpow2.f32 %v1886_v57 }
 0x202   :  { %1984 = vtanh.f32 %v711_v60 }
 0x203   :  { %1986 = vpow2.f32 %v1887_v6 }
 0x20c   :  { %v1981_v61 = vpop.eup %1980 }
 0x20d   :  { %v716_v0 = vadd.f32 1.0, %v1981_v61 }
 0x20e   :  { %v1983_v63 = vpop.eup %1982 }
 0x20f   :  { %1988 = vrcp.f32 %v716_v0  ;;  %v722_v5 = vadd.f32 1.0, %v1983_v63  ;;  %v1985_v62 = vpop.eup %1984  ;;  %v3861_v63 = vld [vmem:[#allocation32_spill] sm:$0xff] }
 0x210   :  { %v1987_v55 = vpop.eup %1986 }
 0x211   :  { %1990 = vrcp.f32 %v722_v5  ;;  %v729_v7 = vadd.f32 1.0, %v1987_v55 }
 0x213   :  { %1992 = vrcp.f32 %v729_v7 }
 0x21c   :  { %v1989_v59 = vpop.eup %1988 }
 0x21d   :  { %v733_v14 = vmul.f32 %v1989_v59, %v1985_v62 }
 0x21e   :  { %v1991_v4 = vpop.eup %1990 }
 0x21f   :  { %v732_v57 = vmul.f32 %v1991_v4, %v2860_v41 }
 0x220   :  { %v1993_v3 = vpop.eup %1992 }
 0x221   :  { %v2934_v23 = vadd.f32 %v733_v14, %v732_v57 }
 0x223   :  { %1994 = vtanh.f32 %v2934_v23 }
 0x230   :  { %v1995_v1 = vpop.eup %1994 }
 0x231   :  { %v736_v56 = vmul.f32 %v1995_v1, %v1993_v3 }
 0x233   :  { %802 = vmatmul.mubr.f32.vlgmr.msra.gmra.mxu0 %v736_v56  ;;  %873 = vmatmul.mubr.f32.vlgmr.msra.gmra.mxu1 %v736_v56 }
 0x234   :  { %908 = vmatpush1.msra.mxu0 %v2271_v8  ;;  %979 = vmatpush1.msra.mxu1 %v2276_v9  ;;  %v3838_v8 = vld [vmem:[#allocation10_spill] sm:$0xff]  ;;  %v3839_v9 = vld [vmem:[#allocation11_spill] sm:$0xff] }
 0x235   :  { %909 = vmatprep.subr.mxu0 %v2283_v10  ;;  %980 = vmatprep.subr.mxu1 %v2288_v11  ;;  %v3840_v10 = vld [vmem:[#allocation12_spill] sm:$0xff]  ;;  %v3841_v11 = vld [vmem:[#allocation13_spill] sm:$0xff] }
 0x236   :  { %910 = vmatpush1.msra.mxu0 %v2297_v12  ;;  %981 = vmatpush1.msra.mxu1 %v2302_v13  ;;  %v3842_v12 = vld [vmem:[#allocation14_spill] sm:$0xff]  ;;  %v3843_v13 = vld [vmem:[#allocation15_spill] sm:$0xff] }
 0x237   :  { %911 = vmatprep.subr.mxu0 %v2314_v15  ;;  %982 = vmatprep.subr.mxu1 %v2319_v16  ;;  %v3844_v15 = vld [vmem:[#allocation16_spill] sm:$0xff]  ;;  %v3845_v16 = vld [vmem:[#allocation17_spill] sm:$0xff] }
 0x238   :  { %912 = vmatpush1.msra.mxu0 %v2326_v17  ;;  %983 = vmatpush1.msra.mxu1 %v2331_v18  ;;  %v3846_v17 = vld [vmem:[#allocation18_spill] sm:$0xff]  ;;  %v3847_v18 = vld [vmem:[#allocation19_spill] sm:$0xff] }
 0x239   :  { %913 = vmatprep.subr.mxu0 %v2338_v19  ;;  %984 = vmatprep.subr.mxu1 %v2343_v20  ;;  %v3848_v19 = vld [vmem:[#allocation20_spill] sm:$0xff]  ;;  %v3849_v20 = vld [vmem:[#allocation21_spill] sm:$0xff] }
 0x23a   :  { %914 = vmatpush1.msra.mxu0 %v2352_v21  ;;  %985 = vmatpush1.msra.mxu1 %v2357_v22  ;;  %v3850_v21 = vld [vmem:[#allocation22_spill] sm:$0xff]  ;;  %v3851_v22 = vld [vmem:[#allocation23_spill] sm:$0xff] }
 0x23b   :  { %915 = vmatprep.subr.mxu0 %v2369_v24  ;;  %986 = vmatprep.subr.mxu1 %v2374_v25  ;;  %v3852_v24 = vld [vmem:[#allocation24_spill] sm:$0xff]  ;;  %v3853_v25 = vld [vmem:[#allocation25_spill] sm:$0xff] }
 0x23c   :  { %916 = vmatpush1.msra.mxu0 %v2381_v26  ;;  %987 = vmatpush1.msra.mxu1 %v2386_v27  ;;  %v3854_v26 = vmov 0.0   ;;  %v3855_v27 = vld [vmem:[#allocation26_spill] sm:$0xff] }
 0x23d   :  { %917 = vmatprep.subr.mxu0 %v2393_v28  ;;  %988 = vmatprep.subr.mxu1 %v2398_v29  ;;  %v3004_v28 = vld [vmem:[%s3663_s4 + $0x1e8] sm:$0xff]  ;;  %v3010_v29 = vld [vmem:[%s3663_s4 + $0x1f8] sm:$0xff] }
 0x23e   :  { %918 = vmatpush1.msra.mxu0 %v2407_v30  ;;  %989 = vmatpush1.msra.mxu1 %v2412_v31  ;;  %3856 = vst [vmem:[#allocation7_spill] sm:$0xff] %v3004_v28  ;;  %3857 = vst [vmem:[#allocation8_spill] sm:$0xff] %v3010_v29  ;;  %v3858_v31 = vld [vmem:[#allocation31_spill] sm:$0xff] }
 0x23f   :  { %919 = vmatprep.subr.mxu0 %v2424_v33  ;;  %990 = vmatprep.subr.mxu1 %v2429_v34 }
 0x240   :  { %920 = vmatpush1.msra.mxu0 %v2436_v35  ;;  %991 = vmatpush1.msra.mxu1 %v2441_v36  ;;  %v3859_v36 = vld [vmem:[#allocation33_spill] sm:$0xff] }
 0x241   :  { %921 = vmatprep.subr.mxu0 %v2448_v37  ;;  %992 = vmatprep.subr.mxu1 %v2453_v38 }
 0x242   :  { %922 = vmatpush1.msra.mxu0 %v2462_v39  ;;  %993 = vmatpush1.msra.mxu1 %v2467_v40 }
 0x243   :  { %923 = vmatprep.subr.mxu0 %v2479_v42  ;;  %994 = vmatprep.subr.mxu1 %v2484_v43 }
 0x244   :  { %924 = vmatpush1.msra.mxu0 %v2491_v44  ;;  %995 = vmatpush1.msra.mxu1 %v2496_v45 }
 0x245   :  { %925 = vmatprep.subr.mxu0 %v2503_v46  ;;  %996 = vmatprep.subr.mxu1 %v2508_v47 }
 0x246   :  { %926 = vmatpush1.msra.mxu0 %v2517_v48  ;;  %997 = vmatpush1.msra.mxu1 %v2522_v49 }
 0x247   :  { %927 = vmatprep.subr.mxu0 %v2534_v51  ;;  %998 = vmatprep.subr.mxu1 %v2539_v52 }
 0x248   :  { %928 = vmatpush1.msra.mxu0 %v2546_v53  ;;  %999 = vmatpush1.msra.mxu1 %v2551_v54 }
 0x249   :  { %929 = vmatprep.subr.mxu0 %v3811_v58  ;;  %1000 = vmatprep.subr.mxu1 %v3812_v32 }
 0x24a   :  { %930 = vmatpush1.msra.mxu0 %v3813_v50  ;;  %1001 = vmatpush1.msra.mxu1 %v3838_v8 }
 0x24b   :  { %931 = vmatprep.subr.mxu0 %v3839_v9  ;;  %1002 = vmatprep.subr.mxu1 %v3840_v10 }
 0x24c   :  { %932 = vmatpush1.msra.mxu0 %v3841_v11  ;;  %1003 = vmatpush1.msra.mxu1 %v3842_v12 }
 0x24d   :  { %933 = vmatprep.subr.mxu0 %v3843_v13  ;;  %1004 = vmatprep.subr.mxu1 %v3844_v15 }
 0x24e   :  { %934 = vmatpush1.msra.mxu0 %v3845_v16  ;;  %1005 = vmatpush1.msra.mxu1 %v3846_v17 }
 0x24f   :  { %935 = vmatprep.subr.mxu0 %v3847_v18  ;;  %1006 = vmatprep.subr.mxu1 %v3848_v19 }
 0x250   :  { %936 = vmatpush1.msra.mxu0 %v3849_v20  ;;  %1007 = vmatpush1.msra.mxu1 %v3850_v21 }
 0x251   :  { %937 = vmatprep.subr.mxu0 %v3851_v22  ;;  %1008 = vmatprep.subr.mxu1 %v3852_v24 }
 0x252   :  { %938 = vmatpush1.msra.mxu0 %v3853_v25  ;;  %971 = vmatprep.mubr.f32.mxu0 %v3854_v26 }
 0x253   :  { %1009 = vmatpush1.msra.mxu1 %v3855_v27  ;;  %1042 = vmatprep.mubr.f32.mxu1 %v3854_v26 }
 0x254   :  { %1077 = vmatprep.subr.mxu0 %v3004_v28  ;;  %1148 = vmatprep.subr.mxu1 %v3010_v29 }
 0x2f3   :  { %v803_v30 = vpop.f32.mrf.mxu0  ;;  %v874_v0 = vpop.f32.mrf.mxu1 }
 0x2f4   :  { %v879_v33 = vadd.f32 %v803_v30, %v3858_v31  ;;  %v881_v5 = vadd.f32 %v874_v0, %v3861_v63  ;;  %v3036_v0 = vld [vmem:[%s3663_s4 + $0x1c8] sm:$0xff]  ;;  %v3066_v63 = vld [vmem:[%s3663_s4 + $0x1b8] sm:$0xff] }
 0x2f5   :  { %v805_v34 = vpop.f32.mrf.mxu0  ;;  %v876_v60 = vpop.f32.mrf.mxu1 }
 0x2f6   :  { %v1888_v35 = vmul.f32 -1.442695, %v879_v33  ;;  %v880_v41 = vadd.f32 %v805_v34, %v3859_v36  ;;  %v882_v61 = vadd.f32 %v876_v60, %v3860_v2  ;;  %v3048_v60 = vld [vmem:[%s3663_s4 + $0x1c0] sm:$0xff]  ;;  %v3054_v2 = vld [vmem:[%s3663_s4 + $0x1d0] sm:$0xff] }
 0x2f8   :  { %1996 = vpow2.f32 %v1888_v35  ;;  %v1889_v6 = vmul.f32 -1.442695, %v880_v41  ;;  %v1890_v62 = vmul.f32 -1.442695, %v882_v61  ;;  %v3024_v41 = vld [vmem:[%s3663_s4 + $0x1e0] sm:$0xff]  ;;  %v3060_v61 = vld [vmem:[%s3663_s4 + $0x1a8] sm:$0xff] }
 0x2fa   :  { %1998 = vpow2.f32 %v1889_v6  ;;  %v3042_v6 = vld [vmem:[%s3663_s4 + $0x1d8] sm:$0xff] }
 0x2fb   :  { %2000 = vtanh.f32 %v881_v5  ;;  %v3072_v5 = vld [vmem:[%s3663_s4 + $0x1a0] sm:$0xff] }
 0x2fc   :  { %2002 = vpow2.f32 %v1890_v62  ;;  %v3078_v62 = vld [vmem:[%s3663_s4 + $0x1b0] sm:$0xff] }
 0x305   :  { %v1997_v55 = vpop.eup %1996 }
 0x306   :  { %v886_v59 = vadd.f32 1.0, %v1997_v55  ;;  %v3084_v55 = vld [vmem:[%s3663_s4 + $0x188] sm:$0xff] }
 0x307   :  { %v1999_v14 = vpop.eup %1998 }
 0x308   :  { %2004 = vrcp.f32 %v886_v59  ;;  %v892_v4 = vadd.f32 1.0, %v1999_v14  ;;  %v2001_v7 = vpop.eup %2000  ;;  %v3090_v59 = vld [vmem:[%s3663_s4 + $0x198] sm:$0xff]  ;;  %v3096_v14 = vld [vmem:[%s3663_s4 + $0x180] sm:$0xff] }
 0x309   :  { %v2003_v57 = vpop.eup %2002 }
 0x30a   :  { %2006 = vrcp.f32 %v892_v4  ;;  %v899_v30 = vadd.f32 1.0, %v2003_v57  ;;  %v3102_v4 = vld [vmem:[%s3663_s4 + $0x190] sm:$0xff]  ;;  %v3114_v57 = vld [vmem:[%s3663_s4 + $0x178] sm:$0xff] }
 0x30c   :  { %2008 = vrcp.f32 %v899_v30  ;;  %v3138_v30 = vld [vmem:[%s3663_s4 + $0x158] sm:$0xff] }
 0x315   :  { %v2005_v3 = vpop.eup %2004 }
 0x316   :  { %v903_v1 = vmul.f32 %v2005_v3, %v2001_v7  ;;  %v3108_v7 = vld [vmem:[%s3663_s4 + $0x168] sm:$0xff]  ;;  %v3120_v3 = vld [vmem:[%s3663_s4 + $0x160] sm:$0xff] }
 0x317   :  { %v2007_v56 = vpop.eup %2006 }
 0x318   :  { %v902_v31 = vmul.f32 %v2007_v56, %v2934_v23  ;;  %v3030_v23 = vld [vmem:[%s3663_s4 + $0x1f0] sm:$0xff]  ;;  %v3132_v56 = vld [vmem:[%s3663_s4 + $0x148] sm:$0xff] }
 0x319   :  { %v2009_v34 = vpop.eup %2008 }
 0x31a   :  { %v3018_v33 = vadd.f32 %v903_v1, %v902_v31  ;;  %v3126_v1 = vld [vmem:[%s3663_s4 + $0x170] sm:$0xff]  ;;  %v3144_v31 = vld [vmem:[%s3663_s4 + $0x140] sm:$0xff] }
 0x31b   :  { %3862 = vst [vmem:[#allocation9_spill] sm:$0xff] %v3144_v31 }
 0x31c   :  { %2010 = vtanh.f32 %v3018_v33 }
 0x329   :  { %v2011_v35 = vpop.eup %2010 }
 0x32a   :  { %v906_v36 = vmul.f32 %v2011_v35, %v2009_v34  ;;  %v3150_v34 = vld [vmem:[%s3663_s4 + $0x150] sm:$0xff]  ;;  %v3156_v35 = vld [vmem:[%s3663_s4 + $0x128] sm:$0xff] }
 0x32b   :  { %3863 = vst [vmem:[#allocation5_spill] sm:$0xff] %v3150_v34 }
 0x32c   :  { %972 = vmatmul.mubr.f32.vlgmr.msra.gmra.mxu0 %v906_v36  ;;  %1043 = vmatmul.mubr.f32.vlgmr.msra.gmra.mxu1 %v906_v36  ;;  %v3162_v36 = vld [vmem:[%s3663_s4 + $0x138] sm:$0xff] }
 0x32d   :  { %1078 = vmatpush1.msra.mxu0 %v3024_v41  ;;  %1149 = vmatpush1.msra.mxu1 %v3030_v23 }
 0x32e   :  { %1079 = vmatprep.subr.mxu0 %v3036_v0  ;;  %1150 = vmatprep.subr.mxu1 %v3042_v6 }
 0x32f   :  { %1080 = vmatpush1.msra.mxu0 %v3048_v60  ;;  %1151 = vmatpush1.msra.mxu1 %v3054_v2 }
 0x330   :  { %1081 = vmatprep.subr.mxu0 %v3060_v61  ;;  %1152 = vmatprep.subr.mxu1 %v3066_v63 }
 0x331   :  { %1082 = vmatpush1.msra.mxu0 %v3072_v5  ;;  %1153 = vmatpush1.msra.mxu1 %v3078_v62 }
 0x332   :  { %1083 = vmatprep.subr.mxu0 %v3084_v55  ;;  %1154 = vmatprep.subr.mxu1 %v3090_v59 }
 0x333   :  { %1084 = vmatpush1.msra.mxu0 %v3096_v14  ;;  %1155 = vmatpush1.msra.mxu1 %v3102_v4 }
 0x334   :  { %1085 = vmatprep.subr.mxu0 %v3108_v7  ;;  %1156 = vmatprep.subr.mxu1 %v3114_v57 }
 0x335   :  { %1086 = vmatpush1.msra.mxu0 %v3120_v3  ;;  %1157 = vmatpush1.msra.mxu1 %v3126_v1 }
 0x336   :  { %1087 = vmatprep.subr.mxu0 %v3132_v56  ;;  %1158 = vmatprep.subr.mxu1 %v3138_v30 }
 0x337   :  { %1088 = vmatpush1.msra.mxu0 %v3144_v31  ;;  %1159 = vmatpush1.msra.mxu1 %v3150_v34  ;;  %v3168_v31 = vld [vmem:[%s3663_s4 + $0x120] sm:$0xff]  ;;  %v3174_v34 = vld [vmem:[%s3663_s4 + $0x130] sm:$0xff] }
 0x338   :  { %1089 = vmatprep.subr.mxu0 %v3156_v35  ;;  %1160 = vmatprep.subr.mxu1 %v3162_v36 }
 0x339   :  { %1090 = vmatpush1.msra.mxu0 %v3168_v31  ;;  %1161 = vmatpush1.msra.mxu1 %v3174_v34 }
 0x33a   :  { %1091 = vmatprep.subr.mxu0 %v2448_v37  ;;  %1162 = vmatprep.subr.mxu1 %v2453_v38  ;;  %v3864_v38 = vld [vmem:[#allocation35_spill] sm:$0xff] }
 0x33b   :  { %1092 = vmatpush1.msra.mxu0 %v2462_v39  ;;  %1163 = vmatpush1.msra.mxu1 %v2467_v40 }
 0x33c   :  { %1093 = vmatprep.subr.mxu0 %v2479_v42  ;;  %1164 = vmatprep.subr.mxu1 %v2484_v43  ;;  %v3865_v43 = vld [vmem:[#allocation37_spill] sm:$0xff] }
 0x33d   :  { %1094 = vmatpush1.msra.mxu0 %v2491_v44  ;;  %1165 = vmatpush1.msra.mxu1 %v2496_v45 }
 0x33e   :  { %1095 = vmatprep.subr.mxu0 %v2503_v46  ;;  %1166 = vmatprep.subr.mxu1 %v2508_v47 }
 0x33f   :  { %1096 = vmatpush1.msra.mxu0 %v2517_v48  ;;  %1167 = vmatpush1.msra.mxu1 %v2522_v49  ;;  %v3866_v48 = vld [vmem:[#allocation38_spill] sm:$0xff] }
 0x340   :  { %1097 = vmatprep.subr.mxu0 %v2534_v51  ;;  %1168 = vmatprep.subr.mxu1 %v2539_v52  ;;  %v3867_v51 = vld [vmem:[#allocation36_spill] sm:$0xff] }
 0x341   :  { %1098 = vmatpush1.msra.mxu0 %v2546_v53  ;;  %1169 = vmatpush1.msra.mxu1 %v2551_v54 }
 0x342   :  { %1099 = vmatprep.subr.mxu0 %v3811_v58  ;;  %1170 = vmatprep.subr.mxu1 %v3812_v32 }
 0x343   :  { %1100 = vmatpush1.msra.mxu0 %v3813_v50  ;;  %1171 = vmatpush1.msra.mxu1 %v3838_v8 }
 0x344   :  { %1101 = vmatprep.subr.mxu0 %v3839_v9  ;;  %1172 = vmatprep.subr.mxu1 %v3840_v10 }
 0x345   :  { %1102 = vmatpush1.msra.mxu0 %v3841_v11  ;;  %1173 = vmatpush1.msra.mxu1 %v3842_v12 }
 0x346   :  { %1103 = vmatprep.subr.mxu0 %v3843_v13  ;;  %1174 = vmatprep.subr.mxu1 %v3844_v15 }
 0x347   :  { %1104 = vmatpush1.msra.mxu0 %v3845_v16  ;;  %1175 = vmatpush1.msra.mxu1 %v3846_v17 }
 0x348   :  { %1105 = vmatprep.subr.mxu0 %v3847_v18  ;;  %1176 = vmatprep.subr.mxu1 %v3848_v19 }
 0x349   :  { %1106 = vmatpush1.msra.mxu0 %v3849_v20  ;;  %1177 = vmatpush1.msra.mxu1 %v3850_v21  ;;  %v3868_v20 = vld [vmem:[#allocation9_spill] sm:$0xff] }
 0x34a   :  { %1107 = vmatprep.subr.mxu0 %v3851_v22  ;;  %1178 = vmatprep.subr.mxu1 %v3852_v24  ;;  %v3869_v21 = vld [vmem:[#allocation5_spill] sm:$0xff]  ;;  %v3254_v22 = vld [vmem:[%s3663_s4 + $0x108] sm:$0xff]  ;;  %v3260_v24 = vld [vmem:[%s3663_s4 + $0x118] sm:$0xff] }
 0x34b   :  { %1108 = vmatpush1.msra.mxu0 %v3853_v25  ;;  %1141 = vmatprep.mubr.f32.mxu0 %v3854_v26  ;;  %v3266_v25 = vld [vmem:[%s3663_s4 + $0x100] sm:$0xff] }
 0x34c   :  { %1179 = vmatpush1.msra.mxu1 %v3855_v27  ;;  %1212 = vmatprep.mubr.f32.mxu1 %v3854_v26  ;;  %v3272_v27 = vld [vmem:[%s3663_s4 + $0x110] sm:$0xff] }
 0x34d   :  { %1247 = vmatprep.subr.mxu0 %v3004_v28  ;;  %1318 = vmatprep.subr.mxu1 %v3010_v29 }
 0x3ec   :  { %v973_v37 = vpop.f32.mrf.mxu0  ;;  %v1044_v45 = vpop.f32.mrf.mxu1 }
 0x3ed   :  { %v1049_v39 = vadd.f32 %v973_v37, %v3864_v38  ;;  %v1051_v52 = vadd.f32 %v1044_v45, %v3867_v51  ;;  %v3284_v37 = vld [vmem:[%s3663_s4 + $0xf8] sm:$0xff]  ;;  %v3290_v38 = vld [vmem:[%s3663_s4 + $0xe0] sm:$0xff]  ;;  %v3326_v45 = vld [vmem:[%s3663_s4 + $0xa8] sm:$0xff] }
 0x3ee   :  { %v975_v40 = vpop.f32.mrf.mxu0  ;;  %v1046_v47 = vpop.f32.mrf.mxu1  ;;  %v3356_v51 = vld [vmem:[%s3663_s4 + $0x98] sm:$0xff] }
 0x3ef   :  { %v1891_v42 = vmul.f32 -1.442695, %v1049_v39  ;;  %v1050_v44 = vadd.f32 %v975_v40, %v3865_v43  ;;  %v1052_v49 = vadd.f32 %v1046_v47, %v3866_v48  ;;  %v3296_v39 = vld [vmem:[%s3663_s4 + $0xf0] sm:$0xff]  ;;  %v3302_v40 = vld [vmem:[%s3663_s4 + $0xc8] sm:$0xff]  ;;  %v3314_v43 = vld [vmem:[%s3663_s4 + $0xc0] sm:$0xff] }
 0x3f0   :  { %v3338_v47 = vld [vmem:[%s3663_s4 + $0xa0] sm:$0xff]  ;;  %v3344_v48 = vld [vmem:[%s3663_s4 + $0xb0] sm:$0xff] }
 0x3f1   :  { %2012 = vpow2.f32 %v1891_v42  ;;  %v1892_v46 = vmul.f32 -1.442695, %v1050_v44  ;;  %v1893_v53 = vmul.f32 -1.442695, %v1052_v49  ;;  %v3308_v42 = vld [vmem:[%s3663_s4 + $0xd8] sm:$0xff]  ;;  %v3320_v44 = vld [vmem:[%s3663_s4 + $0xd0] sm:$0xff] }
 0x3f2   :  { %v3350_v49 = vld [vmem:[%s3663_s4 + $0x88] sm:$0xff] }
 0x3f3   :  { %2014 = vpow2.f32 %v1892_v46  ;;  %v3332_v46 = vld [vmem:[%s3663_s4 + $0xb8] sm:$0xff] }
 0x3f4   :  { %2016 = vtanh.f32 %v1051_v52  ;;  %v3362_v52 = vld [vmem:[%s3663_s4 + $0x80] sm:$0xff] }
 0x3f5   :  { %2018 = vpow2.f32 %v1893_v53  ;;  %v3368_v53 = vld [vmem:[%s3663_s4 + $0x90] sm:$0xff] }
 0x3f6   :  { %3870 = vst [vmem:[#allocation6_spill] sm:$0xff] %v3368_v53 }
 0x3fe   :  { %v2013_v54 = vpop.eup %2012 }
 0x3ff   :  { %v1056_v58 = vadd.f32 1.0, %v2013_v54  ;;  %v3374_v54 = vld [vmem:[%s3663_s4 + $0x68] sm:$0xff] }
 0x400   :  { %v2015_v32 = vpop.eup %2014  ;;  %3871 = vst [vmem:[#allocation27_spill] sm:$0xff] %v3374_v54 }
 0x401   :  { %2020 = vrcp.f32 %v1056_v58  ;;  %v1062_v50 = vadd.f32 1.0, %v2015_v32  ;;  %v2017_v8 = vpop.eup %2016  ;;  %v3380_v58 = vld [vmem:[%s3663_s4 + $0x78] sm:$0xff]  ;;  %v3386_v32 = vld [vmem:[%s3663_s4 + $0x60] sm:$0xff] }
 0x402   :  { %v2019_v9 = vpop.eup %2018  ;;  %3872 = vst [vmem:[#allocation29_spill] sm:$0xff] %v3380_v58  ;;  %3873 = vst [vmem:[#allocation30_spill] sm:$0xff] %v3386_v32 }
 0x403   :  { %2022 = vrcp.f32 %v1062_v50  ;;  %v1069_v13 = vadd.f32 1.0, %v2019_v9  ;;  %v3392_v50 = vld [vmem:[%s3663_s4 + $0x70] sm:$0xff]  ;;  %v3404_v9 = vld [vmem:[%s3663_s4 + $0x58] sm:$0xff] }
 0x404   :  { %3874 = vst [vmem:[#allocation28_spill] sm:$0xff] %v3392_v50  ;;  %3876 = vst [vmem:[#allocation11_spill] sm:$0xff] %v3404_v9 }
 0x405   :  { %2024 = vrcp.f32 %v1069_v13  ;;  %v3428_v13 = vld [vmem:[%s3663_s4 + $0x38] sm:$0xff] }
 0x406   :  { %3880 = vst [vmem:[#allocation15_spill] sm:$0xff] %v3428_v13 }
 0x40e   :  { %v2021_v10 = vpop.eup %2020 }
 0x40f   :  { %v1073_v11 = vmul.f32 %v2021_v10, %v2017_v8  ;;  %v3398_v8 = vld [vmem:[%s3663_s4 + $0x48] sm:$0xff]  ;;  %v3410_v10 = vld [vmem:[%s3663_s4 + $0x40] sm:$0xff] }
 0x410   :  { %v2023_v12 = vpop.eup %2022  ;;  %3875 = vst [vmem:[#allocation10_spill] sm:$0xff] %v3398_v8  ;;  %3877 = vst [vmem:[#allocation12_spill] sm:$0xff] %v3410_v10 }
 0x411   :  { %v1072_v15 = vmul.f32 %v2023_v12, %v3018_v33  ;;  %v3278_v33 = vld [vmem:[%s3663_s4 + $0xe8] sm:$0xff] }
 0x412   :  { %v2025_v17 = vpop.eup %2024  ;;  %v3422_v12 = vld [vmem:[%s3663_s4 + $0x28] sm:$0xff] }
 0x413   :  { %v3222_v16 = vadd.f32 %v1073_v11, %v1072_v15  ;;  %v3416_v11 = vld [vmem:[%s3663_s4 + $0x50] sm:$0xff]  ;;  %3879 = vst [vmem:[#allocation14_spill] sm:$0xff] %v3422_v12  ;;  %v3434_v15 = vld [vmem:[%s3663_s4 + $0x20] sm:$0xff] }
 0x414   :  { %3878 = vst [vmem:[#allocation13_spill] sm:$0xff] %v3416_v11  ;;  %3881 = vst [vmem:[#allocation16_spill] sm:$0xff] %v3434_v15 }
 0x415   :  { %2026 = vtanh.f32 %v3222_v16 }
 0x422   :  { %v2027_v18 = vpop.eup %2026 }
 0x423   :  { %v1076_v19 = vmul.f32 %v2027_v18, %v2025_v17  ;;  %v3440_v17 = vld [vmem:[%s3663_s4 + $0x30] sm:$0xff]  ;;  %v3446_v18 = vld [vmem:[%s3663_s4 + $0x8] sm:$0xff] }
 0x424   :  { %3882 = vst [vmem:[#allocation17_spill] sm:$0xff] %v3440_v17  ;;  %3883 = vst [vmem:[#allocation18_spill] sm:$0xff] %v3446_v18 }
 0x425   :  { %1142 = vmatmul.mubr.f32.vlgmr.msra.gmra.mxu0 %v1076_v19  ;;  %1213 = vmatmul.mubr.f32.vlgmr.msra.gmra.mxu1 %v1076_v19  ;;  %v3452_v19 = vld [vmem:[%s3663_s4 + $0x18] sm:$0xff] }
 0x426   :  { %1248 = vmatpush1.msra.mxu0 %v3024_v41  ;;  %1319 = vmatpush1.msra.mxu1 %v3030_v23  ;;  %3884 = vst [vmem:[#allocation19_spill] sm:$0xff] %v3452_v19 }
 0x427   :  { %1249 = vmatprep.subr.mxu0 %v3036_v0  ;;  %1320 = vmatprep.subr.mxu1 %v3042_v6 }
 0x428   :  { %1250 = vmatpush1.msra.mxu0 %v3048_v60  ;;  %1321 = vmatpush1.msra.mxu1 %v3054_v2 }
 0x429   :  { %1251 = vmatprep.subr.mxu0 %v3060_v61  ;;  %1322 = vmatprep.subr.mxu1 %v3066_v63 }
 0x42a   :  { %1252 = vmatpush1.msra.mxu0 %v3072_v5  ;;  %1323 = vmatpush1.msra.mxu1 %v3078_v62 }
 0x42b   :  { %1253 = vmatprep.subr.mxu0 %v3084_v55  ;;  %1324 = vmatprep.subr.mxu1 %v3090_v59 }
 0x42c   :  { %1254 = vmatpush1.msra.mxu0 %v3096_v14  ;;  %1325 = vmatpush1.msra.mxu1 %v3102_v4 }
 0x42d   :  { %1255 = vmatprep.subr.mxu0 %v3108_v7  ;;  %1326 = vmatprep.subr.mxu1 %v3114_v57 }
 0x42e   :  { %1256 = vmatpush1.msra.mxu0 %v3120_v3  ;;  %1327 = vmatpush1.msra.mxu1 %v3126_v1 }
 0x42f   :  { %1257 = vmatprep.subr.mxu0 %v3132_v56  ;;  %1328 = vmatprep.subr.mxu1 %v3138_v30 }
 0x430   :  { %1258 = vmatpush1.msra.mxu0 %v3868_v20  ;;  %1329 = vmatpush1.msra.mxu1 %v3869_v21 }
 0x431   :  { %1259 = vmatprep.subr.mxu0 %v3156_v35  ;;  %1330 = vmatprep.subr.mxu1 %v3162_v36 }
 0x432   :  { %1260 = vmatpush1.msra.mxu0 %v3168_v31  ;;  %1331 = vmatpush1.msra.mxu1 %v3174_v34 }
 0x433   :  { %1261 = vmatprep.subr.mxu0 %v3254_v22  ;;  %1332 = vmatprep.subr.mxu1 %v3260_v24 }
 0x434   :  { %1262 = vmatpush1.msra.mxu0 %v3266_v25  ;;  %1333 = vmatpush1.msra.mxu1 %v3272_v27 }
 0x435   :  { %1263 = vmatprep.subr.mxu0 %v3278_v33  ;;  %1334 = vmatprep.subr.mxu1 %v3284_v37 }
 0x436   :  { %1264 = vmatpush1.msra.mxu0 %v3290_v38  ;;  %1335 = vmatpush1.msra.mxu1 %v3296_v39 }
 0x437   :  { %1265 = vmatprep.subr.mxu0 %v3302_v40  ;;  %1336 = vmatprep.subr.mxu1 %v3308_v42 }
 0x438   :  { %1266 = vmatpush1.msra.mxu0 %v3314_v43  ;;  %1337 = vmatpush1.msra.mxu1 %v3320_v44 }
 0x439   :  { %1267 = vmatprep.subr.mxu0 %v3326_v45  ;;  %1338 = vmatprep.subr.mxu1 %v3332_v46 }
 0x43a   :  { %1268 = vmatpush1.msra.mxu0 %v3338_v47  ;;  %1339 = vmatpush1.msra.mxu1 %v3344_v48 }
 0x43b   :  { %1269 = vmatprep.subr.mxu0 %v3350_v49  ;;  %1340 = vmatprep.subr.mxu1 %v3356_v51 }
 0x43c   :  { %1270 = vmatpush1.msra.mxu0 %v3362_v52  ;;  %1341 = vmatpush1.msra.mxu1 %v3368_v53 }
 0x43d   :  { %1271 = vmatprep.subr.mxu0 %v3374_v54  ;;  %1342 = vmatprep.subr.mxu1 %v3380_v58  ;;  %v3890_v58 = vld [vmem:[#allocation40_spill] sm:$0xff] }
 0x43e   :  { %1272 = vmatpush1.msra.mxu0 %v3386_v32  ;;  %1343 = vmatpush1.msra.mxu1 %v3392_v50  ;;  %v3889_v32 = vld [vmem:[#allocation42_spill] sm:$0xff] }
 0x43f   :  { %1273 = vmatprep.subr.mxu0 %v3398_v8  ;;  %1344 = vmatprep.subr.mxu1 %v3404_v9 }
 0x440   :  { %1274 = vmatpush1.msra.mxu0 %v3410_v10  ;;  %1345 = vmatpush1.msra.mxu1 %v3416_v11  ;;  %v3888_v11 = vld [vmem:[#allocation41_spill] sm:$0xff] }
 0x441   :  { %1275 = vmatprep.subr.mxu0 %v3422_v12  ;;  %1346 = vmatprep.subr.mxu1 %v3428_v13 }
 0x442   :  { %1276 = vmatpush1.msra.mxu0 %v3434_v15  ;;  %1347 = vmatpush1.msra.mxu1 %v3440_v17  ;;  %v3458_v15 = vld [vmem:[%s3663_s4] sm:$0xff]  ;;  %v3887_v17 = vld [vmem:[#allocation39_spill] sm:$0xff] }
 0x443   :  { %1277 = vmatprep.subr.mxu0 %v3446_v18  ;;  %1348 = vmatprep.subr.mxu1 %v3452_v19  ;;  %3885 = vst [vmem:[#allocation20_spill] sm:$0xff] %v3458_v15  ;;  %v3465_v18 = vld [vmem:[%s3663_s4 + $0x10] sm:$0xff] }
 0x444   :  { %1278 = vmatpush1.msra.mxu0 %v3458_v15  ;;  %1311 = vmatprep.mubr.f32.mxu0 %v3854_v26  ;;  %3886 = vst [vmem:[#allocation21_spill] sm:$0xff] %v3465_v18 }
 0x445   :  { %1349 = vmatpush1.msra.mxu1 %v3465_v18  ;;  %1382 = vmatprep.mubr.f32.mxu1 %v3854_v26 }
 0x446   :  { %1417 = vmatprep.subr.mxu0 %v3004_v28  ;;  %1488 = vmatprep.subr.mxu1 %v3010_v29 }
 0x4e5   :  { %v1143_v19 = vpop.f32.mrf.mxu0  ;;  %v1214_v9 = vpop.f32.mrf.mxu1 }
 0x4e6   :  { %v1219_v13 = vadd.f32 %v1143_v19, %v3887_v17  ;;  %v1221_v26 = vadd.f32 %v1214_v9, %v3890_v58  ;;  %v3896_v9 = vld [vmem:[#allocation10_spill] sm:$0xff] }
 0x4e7   :  { %v1145_v12 = vpop.f32.mrf.mxu0  ;;  %v1216_v50 = vpop.f32.mrf.mxu1 }
 0x4e8   :  { %v1894_v15 = vmul.f32 -1.442695, %v1219_v13  ;;  %v1220_v10 = vadd.f32 %v1145_v12, %v3888_v11  ;;  %v1222_v18 = vadd.f32 %v1216_v50, %v3889_v32  ;;  %v3895_v50 = vld [vmem:[#allocation28_spill] sm:$0xff] }
 0x4ea   :  { %2028 = vpow2.f32 %v1894_v15  ;;  %v1895_v8 = vmul.f32 -1.442695, %v1220_v10  ;;  %v1896_v54 = vmul.f32 -1.442695, %v1222_v18  ;;  %v3897_v18 = vld [vmem:[#allocation11_spill] sm:$0xff] }
 0x4ec   :  { %2030 = vpow2.f32 %v1895_v8 }
 0x4ed   :  { %2032 = vtanh.f32 %v1221_v26 }
 0x4ee   :  { %2034 = vpow2.f32 %v1896_v54  ;;  %v3894_v54 = vld [vmem:[#allocation30_spill] sm:$0xff] }
 0x4f7   :  { %v2029_v28 = vpop.eup %2028 }
 0x4f8   :  { %v1226_v53 = vadd.f32 1.0, %v2029_v28 }
 0x4f9   :  { %v2031_v29 = vpop.eup %2030 }
 0x4fa   :  { %2036 = vrcp.f32 %v1226_v53  ;;  %v1232_v17 = vadd.f32 1.0, %v2031_v29  ;;  %v2033_v13 = vpop.eup %2032  ;;  %v3891_v29 = vld [vmem:[#allocation6_spill] sm:$0xff]  ;;  %v3893_v53 = vld [vmem:[#allocation29_spill] sm:$0xff] }
 0x4fb   :  { %v2035_v11 = vpop.eup %2034 }
 0x4fc   :  { %2038 = vrcp.f32 %v1232_v17  ;;  %v1239_v8 = vadd.f32 1.0, %v2035_v11  ;;  %v3898_v17 = vld [vmem:[#allocation12_spill] sm:$0xff]  ;;  %v3900_v11 = vld [vmem:[#allocation14_spill] sm:$0xff] }
 0x4fe   :  { %2040 = vrcp.f32 %v1239_v8  ;;  %v3904_v8 = vld [vmem:[#allocation18_spill] sm:$0xff] }
 0x507   :  { %v2037_v12 = vpop.eup %2036 }
 0x508   :  { %v1243_v15 = vmul.f32 %v2037_v12, %v2033_v13  ;;  %v3899_v13 = vld [vmem:[#allocation13_spill] sm:$0xff]  ;;  %v3901_v12 = vld [vmem:[#allocation15_spill] sm:$0xff] }
 0x509   :  { %v2039_v10 = vpop.eup %2038 }
 0x50a   :  { %v1242_v19 = vmul.f32 %v2039_v10, %v3222_v16  ;;  %v3892_v16 = vld [vmem:[#allocation27_spill] sm:$0xff]  ;;  %v3903_v10 = vld [vmem:[#allocation17_spill] sm:$0xff] }
 0x50b   :  { %v2041_v28 = vpop.eup %2040 }
 0x50c   :  { %v3476_v32 = vadd.f32 %v1243_v15, %v1242_v19  ;;  %v3902_v15 = vld [vmem:[#allocation16_spill] sm:$0xff]  ;;  %v3905_v19 = vld [vmem:[#allocation19_spill] sm:$0xff] }
 0x50e   :  { %2042 = vtanh.f32 %v3476_v32 }
 0x51b   :  { %v2043_v26 = vpop.eup %2042 }
 0x51c   :  { %v1246_v58 = vmul.f32 %v2043_v26, %v2041_v28  ;;  %v3906_v28 = vld [vmem:[#allocation20_spill] sm:$0xff]  ;;  %v3907_v26 = vmov 0.0  }
 0x51e   :  { %1312 = vmatmul.mubr.f32.vlgmr.msra.gmra.mxu0 %v1246_v58  ;;  %1383 = vmatmul.mubr.f32.vlgmr.msra.gmra.mxu1 %v1246_v58  ;;  %v3908_v58 = vld [vmem:[#allocation21_spill] sm:$0xff] }
 0x51f   :  { %1418 = vmatpush1.msra.mxu0 %v3024_v41  ;;  %1489 = vmatpush1.msra.mxu1 %v3030_v23 }
 0x520   :  { %1419 = vmatprep.subr.mxu0 %v3036_v0  ;;  %1490 = vmatprep.subr.mxu1 %v3042_v6 }
 0x521   :  { %1420 = vmatpush1.msra.mxu0 %v3048_v60  ;;  %1491 = vmatpush1.msra.mxu1 %v3054_v2 }
 0x522   :  { %1421 = vmatprep.subr.mxu0 %v3060_v61  ;;  %1492 = vmatprep.subr.mxu1 %v3066_v63 }
 0x523   :  { %1422 = vmatpush1.msra.mxu0 %v3072_v5  ;;  %1493 = vmatpush1.msra.mxu1 %v3078_v62 }
 0x524   :  { %1423 = vmatprep.subr.mxu0 %v3084_v55  ;;  %1494 = vmatprep.subr.mxu1 %v3090_v59 }
 0x525   :  { %1424 = vmatpush1.msra.mxu0 %v3096_v14  ;;  %1495 = vmatpush1.msra.mxu1 %v3102_v4 }
 0x526   :  { %1425 = vmatprep.subr.mxu0 %v3108_v7  ;;  %1496 = vmatprep.subr.mxu1 %v3114_v57 }
 0x527   :  { %1426 = vmatpush1.msra.mxu0 %v3120_v3  ;;  %1497 = vmatpush1.msra.mxu1 %v3126_v1 }
 0x528   :  { %1427 = vmatprep.subr.mxu0 %v3132_v56  ;;  %1498 = vmatprep.subr.mxu1 %v3138_v30 }
 0x529   :  { %1428 = vmatpush1.msra.mxu0 %v3868_v20  ;;  %1499 = vmatpush1.msra.mxu1 %v3869_v21 }
 0x52a   :  { %1429 = vmatprep.subr.mxu0 %v3156_v35  ;;  %1500 = vmatprep.subr.mxu1 %v3162_v36 }
 0x52b   :  { %1430 = vmatpush1.msra.mxu0 %v3168_v31  ;;  %1501 = vmatpush1.msra.mxu1 %v3174_v34 }
 0x52c   :  { %1431 = vmatprep.subr.mxu0 %v3254_v22  ;;  %1502 = vmatprep.subr.mxu1 %v3260_v24 }
 0x52d   :  { %1432 = vmatpush1.msra.mxu0 %v3266_v25  ;;  %1503 = vmatpush1.msra.mxu1 %v3272_v27 }
 0x52e   :  { %1433 = vmatprep.subr.mxu0 %v3278_v33  ;;  %1504 = vmatprep.subr.mxu1 %v3284_v37 }
 0x52f   :  { %1434 = vmatpush1.msra.mxu0 %v3290_v38  ;;  %1505 = vmatpush1.msra.mxu1 %v3296_v39 }
 0x530   :  { %1435 = vmatprep.subr.mxu0 %v3302_v40  ;;  %1506 = vmatprep.subr.mxu1 %v3308_v42 }
 0x531   :  { %1436 = vmatpush1.msra.mxu0 %v3314_v43  ;;  %1507 = vmatpush1.msra.mxu1 %v3320_v44 }
 0x532   :  { %1437 = vmatprep.subr.mxu0 %v3326_v45  ;;  %1508 = vmatprep.subr.mxu1 %v3332_v46 }
 0x533   :  { %1438 = vmatpush1.msra.mxu0 %v3338_v47  ;;  %1509 = vmatpush1.msra.mxu1 %v3344_v48 }
 0x534   :  { %1439 = vmatprep.subr.mxu0 %v3350_v49  ;;  %1510 = vmatprep.subr.mxu1 %v3356_v51 }
 0x535   :  { %1440 = vmatpush1.msra.mxu0 %v3362_v52  ;;  %1511 = vmatpush1.msra.mxu1 %v3891_v29 }
 0x536   :  { %1441 = vmatprep.subr.mxu0 %v3892_v16  ;;  %1512 = vmatprep.subr.mxu1 %v3893_v53  ;;  %v3914_v53 = vld [vmem:[#allocation44_spill] sm:$0xff] }
 0x537   :  { %1442 = vmatpush1.msra.mxu0 %v3894_v54  ;;  %1513 = vmatpush1.msra.mxu1 %v3895_v50  ;;  %v3913_v54 = vld [vmem:[#allocation46_spill] sm:$0xff] }
 0x538   :  { %1443 = vmatprep.subr.mxu0 %v3896_v9  ;;  %1514 = vmatprep.subr.mxu1 %v3897_v18 }
 0x539   :  { %1444 = vmatpush1.msra.mxu0 %v3898_v17  ;;  %1515 = vmatpush1.msra.mxu1 %v3899_v13  ;;  %v3909_v13 = vld [vmem:[#allocation7_spill] sm:$0xff] }
 0x53a   :  { %1445 = vmatprep.subr.mxu0 %v3900_v11  ;;  %1516 = vmatprep.subr.mxu1 %v3901_v12  ;;  %v3910_v11 = vld [vmem:[#allocation8_spill] sm:$0xff] }
 0x53b   :  { %1446 = vmatpush1.msra.mxu0 %v3902_v15  ;;  %1517 = vmatpush1.msra.mxu1 %v3903_v10  ;;  %v3911_v15 = vld [vmem:[#allocation43_spill] sm:$0xff] }
 0x53c   :  { %1447 = vmatprep.subr.mxu0 %v3904_v8  ;;  %1518 = vmatprep.subr.mxu1 %v3905_v19  ;;  %v3912_v8 = vld [vmem:[#allocation45_spill] sm:$0xff] }
 0x53d   :  { %1448 = vmatpush1.msra.mxu0 %v3906_v28  ;;  %1481 = vmatprep.mubr.f32.mxu0 %v3907_v26 }
 0x53e   :  { %1519 = vmatpush1.msra.mxu1 %v3908_v58  ;;  %1552 = vmatprep.mubr.f32.mxu1 %v3907_v26 }
 0x53f   :  { %1587 = vmatprep.subr.mxu0 %v3909_v13  ;;  %1658 = vmatprep.subr.mxu1 %v3910_v11 }
 0x5de   :  { %v1313_v12 = vpop.f32.mrf.mxu0  ;;  %v1384_v19 = vpop.f32.mrf.mxu1 }
 0x5df   :  { %v1389_v17 = vadd.f32 %v1313_v12, %v3911_v15  ;;  %v1391_v26 = vadd.f32 %v1384_v19, %v3914_v53 }
 0x5e0   :  { %v1315_v10 = vpop.f32.mrf.mxu0  ;;  %v1386_v50 = vpop.f32.mrf.mxu1 }
 0x5e1   :  { %v1897_v18 = vmul.f32 -1.442695, %v1389_v17  ;;  %v1390_v9 = vadd.f32 %v1315_v10, %v3912_v8  ;;  %v1392_v58 = vadd.f32 %v1386_v50, %v3913_v54 }
 0x5e3   :  { %2044 = vpow2.f32 %v1897_v18  ;;  %v1898_v28 = vmul.f32 -1.442695, %v1390_v9  ;;  %v1899_v16 = vmul.f32 -1.442695, %v1392_v58  ;;  %v1773_v58 = vld [vmem:[#allocation2 + $0x70] sm:$0xff] }
 0x5e5   :  { %2046 = vpow2.f32 %v1898_v28 }
 0x5e6   :  { %2048 = vtanh.f32 %v1391_v26  ;;  %v1774_v26 = vld [vmem:[#allocation2 + $0x78] sm:$0xff] }
 0x5e7   :  { %2050 = vpow2.f32 %v1899_v16 }
 0x5f0   :  { %v2045_v13 = vpop.eup %2044 }
 0x5f1   :  { %v1396_v29 = vadd.f32 1.0, %v2045_v13  ;;  %v1772_v13 = vld [vmem:[#allocation2 + $0x68] sm:$0xff] }
 0x5f2   :  { %v2047_v11 = vpop.eup %2046 }
 0x5f3   :  { %2052 = vrcp.f32 %v1396_v29  ;;  %v1402_v12 = vadd.f32 1.0, %v2047_v11  ;;  %v2049_v17 = vpop.eup %2048  ;;  %v1771_v11 = vld [vmem:[#allocation2 + $0x60] sm:$0xff] }
 0x5f4   :  { %v2051_v15 = vpop.eup %2050 }
 0x5f5   :  { %2054 = vrcp.f32 %v1402_v12  ;;  %v1409_v8 = vadd.f32 1.0, %v2051_v15  ;;  %v1770_v12 = vld [vmem:[#allocation2 + $0x58] sm:$0xff]  ;;  %v1768_v15 = vld [vmem:[#allocation2 + $0x48] sm:$0xff] }
 0x5f7   :  { %2056 = vrcp.f32 %v1409_v8  ;;  %v1764_v8 = vld [vmem:[#allocation2 + $0x28] sm:$0xff] }
 0x600   :  { %v2053_v18 = vpop.eup %2052 }
 0x601   :  { %v1413_v10 = vmul.f32 %v2053_v18, %v2049_v17  ;;  %v1769_v17 = vld [vmem:[#allocation2 + $0x50] sm:$0xff]  ;;  %v1767_v18 = vld [vmem:[#allocation2 + $0x40] sm:$0xff] }
 0x602   :  { %v2055_v9 = vpop.eup %2054 }
 0x603   :  { %v1412_v28 = vmul.f32 %v2055_v9, %v3476_v32  ;;  %v1765_v9 = vld [vmem:[#allocation2 + $0x30] sm:$0xff] }
 0x604   :  { %v2057_v53 = vpop.eup %2056 }
 0x605   :  { %v3550_v54 = vadd.f32 %v1413_v10, %v1412_v28  ;;  %v1766_v10 = vld [vmem:[#allocation2 + $0x38] sm:$0xff]  ;;  %v1763_v28 = vld [vmem:[#allocation2 + $0x20] sm:$0xff] }
 0x607   :  { %2058 = vtanh.f32 %v3550_v54 }
 0x614   :  { %v2059_v50 = vpop.eup %2058 }
 0x615   :  { %v1416_v19 = vmul.f32 %v2059_v50, %v2057_v53  ;;  %v1761_v53 = vld [vmem:[#allocation2 + $0x10] sm:$0xff]  ;;  %v1760_v50 = vld [vmem:[#allocation2 + $0x8] sm:$0xff] }
 0x617   :  { %1482 = vmatmul.mubr.f32.vlgmr.msra.gmra.mxu0 %v1416_v19  ;;  %1553 = vmatmul.mubr.f32.vlgmr.msra.gmra.mxu1 %v1416_v19  ;;  %v1759_v19 = vld [vmem:[#allocation2] sm:$0xff] }
 0x618   :  { %1588 = vmatpush1.msra.mxu0 %v3024_v41  ;;  %1659 = vmatpush1.msra.mxu1 %v3030_v23  ;;  %v3915_v41 = vld [vmem:[#allocation6_spill] sm:$0xff]  ;;  %v3916_v23 = vld [vmem:[#allocation27_spill] sm:$0xff] }
 0x619   :  { %1589 = vmatprep.subr.mxu0 %v3036_v0  ;;  %1660 = vmatprep.subr.mxu1 %v3042_v6  ;;  %v3917_v0 = vld [vmem:[#allocation29_spill] sm:$0xff]  ;;  %v3918_v6 = vld [vmem:[#allocation30_spill] sm:$0xff] }
 0x61a   :  { %1590 = vmatpush1.msra.mxu0 %v3048_v60  ;;  %1661 = vmatpush1.msra.mxu1 %v3054_v2  ;;  %v3919_v60 = vld [vmem:[#allocation28_spill] sm:$0xff]  ;;  %v3920_v2 = vld [vmem:[#allocation10_spill] sm:$0xff] }
 0x61b   :  { %1591 = vmatprep.subr.mxu0 %v3060_v61  ;;  %1662 = vmatprep.subr.mxu1 %v3066_v63  ;;  %v3921_v61 = vld [vmem:[#allocation11_spill] sm:$0xff]  ;;  %v3922_v63 = vld [vmem:[#allocation12_spill] sm:$0xff] }
 0x61c   :  { %1592 = vmatpush1.msra.mxu0 %v3072_v5  ;;  %1663 = vmatpush1.msra.mxu1 %v3078_v62  ;;  %v3923_v5 = vld [vmem:[#allocation13_spill] sm:$0xff]  ;;  %v3924_v62 = vld [vmem:[#allocation14_spill] sm:$0xff] }
 0x61d   :  { %1593 = vmatprep.subr.mxu0 %v3084_v55  ;;  %1664 = vmatprep.subr.mxu1 %v3090_v59  ;;  %v3925_v55 = vld [vmem:[#allocation15_spill] sm:$0xff]  ;;  %v3926_v59 = vld [vmem:[#allocation16_spill] sm:$0xff] }
 0x61e   :  { %1594 = vmatpush1.msra.mxu0 %v3096_v14  ;;  %1665 = vmatpush1.msra.mxu1 %v3102_v4  ;;  %v3927_v14 = vld [vmem:[#allocation17_spill] sm:$0xff]  ;;  %v3928_v4 = vld [vmem:[#allocation18_spill] sm:$0xff] }
 0x61f   :  { %1595 = vmatprep.subr.mxu0 %v3108_v7  ;;  %1666 = vmatprep.subr.mxu1 %v3114_v57  ;;  %v3929_v7 = vld [vmem:[#allocation19_spill] sm:$0xff]  ;;  %v3930_v57 = vld [vmem:[#allocation20_spill] sm:$0xff] }
 0x620   :  { %1596 = vmatpush1.msra.mxu0 %v3120_v3  ;;  %1667 = vmatpush1.msra.mxu1 %v3126_v1  ;;  %v3931_v3 = vmov 0.0   ;;  %v3932_v1 = vld [vmem:[#allocation21_spill] sm:$0xff] }
 0x621   :  { %1597 = vmatprep.subr.mxu0 %v3132_v56  ;;  %1668 = vmatprep.subr.mxu1 %v3138_v30  ;;  %v3933_v30 = vld [vmem:[#allocation47_spill] sm:$0xff] }
 0x622   :  { %1598 = vmatpush1.msra.mxu0 %v3868_v20  ;;  %1669 = vmatpush1.msra.mxu1 %v3869_v21 }
 0x623   :  { %1599 = vmatprep.subr.mxu0 %v3156_v35  ;;  %1670 = vmatprep.subr.mxu1 %v3162_v36  ;;  %v3934_v36 = vld [vmem:[#allocation49_spill] sm:$0xff] }
 0x624   :  { %1600 = vmatpush1.msra.mxu0 %v3168_v31  ;;  %1671 = vmatpush1.msra.mxu1 %v3174_v34 }
 0x625   :  { %1601 = vmatprep.subr.mxu0 %v3254_v22  ;;  %1672 = vmatprep.subr.mxu1 %v3260_v24 }
 0x626   :  { %1602 = vmatpush1.msra.mxu0 %v3266_v25  ;;  %1673 = vmatpush1.msra.mxu1 %v3272_v27  ;;  %v3935_v25 = vld [vmem:[#allocation50_spill] sm:$0xff] }
 0x627   :  { %1603 = vmatprep.subr.mxu0 %v3278_v33  ;;  %1674 = vmatprep.subr.mxu1 %v3284_v37  ;;  %v3936_v33 = vld [vmem:[#allocation48_spill] sm:$0xff] }
 0x628   :  { %1604 = vmatpush1.msra.mxu0 %v3290_v38  ;;  %1675 = vmatpush1.msra.mxu1 %v3296_v39 }
 0x629   :  { %1605 = vmatprep.subr.mxu0 %v3302_v40  ;;  %1676 = vmatprep.subr.mxu1 %v3308_v42 }
 0x62a   :  { %1606 = vmatpush1.msra.mxu0 %v3314_v43  ;;  %1677 = vmatpush1.msra.mxu1 %v3320_v44 }
 0x62b   :  { %1607 = vmatprep.subr.mxu0 %v3326_v45  ;;  %1678 = vmatprep.subr.mxu1 %v3332_v46 }
 0x62c   :  { %1608 = vmatpush1.msra.mxu0 %v3338_v47  ;;  %1679 = vmatpush1.msra.mxu1 %v3344_v48 }
 0x62d   :  { %1609 = vmatprep.subr.mxu0 %v3350_v49  ;;  %1680 = vmatprep.subr.mxu1 %v3356_v51 }
 0x62e   :  { %1610 = vmatpush1.msra.mxu0 %v3362_v52  ;;  %1681 = vmatpush1.msra.mxu1 %v3915_v41 }
 0x62f   :  { %1611 = vmatprep.subr.mxu0 %v3916_v23  ;;  %1682 = vmatprep.subr.mxu1 %v3917_v0  ;;  %v3937_v23 = vld [vmem:[#allocation51_spill] sm:$0xff] }
 0x630   :  { %1612 = vmatpush1.msra.mxu0 %v3918_v6  ;;  %1683 = vmatpush1.msra.mxu1 %v3919_v60 }
 0x631   :  { %1613 = vmatprep.subr.mxu0 %v3920_v2  ;;  %1684 = vmatprep.subr.mxu1 %v3921_v61  ;;  %v3938_v2 = vld [vmem:[#allocation53_spill] sm:$0xff] }
 0x632   :  { %1614 = vmatpush1.msra.mxu0 %v3922_v63  ;;  %1685 = vmatpush1.msra.mxu1 %v3923_v5 }
 0x633   :  { %1615 = vmatprep.subr.mxu0 %v3924_v62  ;;  %1686 = vmatprep.subr.mxu1 %v3925_v55  ;;  %v3939_v55 = vld [vmem:[#allocation54_spill] sm:$0xff] }
 0x634   :  { %1616 = vmatpush1.msra.mxu0 %v3926_v59  ;;  %1687 = vmatpush1.msra.mxu1 %v3927_v14  ;;  %v3940_v14 = vld [vmem:[#allocation52_spill] sm:$0xff] }
 0x635   :  { %1617 = vmatprep.subr.mxu0 %v3928_v4  ;;  %1688 = vmatprep.subr.mxu1 %v3929_v7 }
 0x636   :  { %1618 = vmatpush1.msra.mxu0 %v3930_v57  ;;  %1651 = vmatprep.mubr.f32.mxu0 %v3931_v3 }
 0x637   :  { %1689 = vmatpush1.msra.mxu1 %v3932_v1  ;;  %1722 = vmatprep.mubr.f32.mxu1 %v3931_v3 }
 0x638   :  { %1924 = vmatprep.subr.mxu0 %v3931_v3 }
 0x6d7   :  { %v1483_v56 = vpop.f32.mrf.mxu0  ;;  %v1554_v21 = vpop.f32.mrf.mxu1 }
 0x6d8   :  { %v1559_v31 = vadd.f32 %v1483_v56, %v3933_v30  ;;  %v1561_v37 = vadd.f32 %v1554_v21, %v3936_v33  ;;  %v1906_v33 = vld [vmem:[%s3666_s7] ss:$0 sm:$0xff] }
 0x6d9   :  { %v1485_v34 = vpop.f32.mrf.mxu0  ;;  %v1556_v24 = vpop.f32.mrf.mxu1 }
 0x6da   :  { %v1900_v35 = vmul.f32 -1.442695, %v1559_v31  ;;  %v1560_v20 = vadd.f32 %v1485_v34, %v3934_v36  ;;  %v1562_v27 = vadd.f32 %v1556_v24, %v3935_v25 }
 0x6dc   :  { %2060 = vpow2.f32 %v1900_v35  ;;  %v1901_v22 = vmul.f32 -1.442695, %v1560_v20  ;;  %v1902_v38 = vmul.f32 -1.442695, %v1562_v27 }
 0x6de   :  { %2062 = vpow2.f32 %v1901_v22 }
 0x6df   :  { %2064 = vtanh.f32 %v1561_v37 }
 0x6e0   :  { %2066 = vpow2.f32 %v1902_v38 }
 0x6e9   :  { %v2061_v39 = vpop.eup %2060 }
 0x6ea   :  { %v1566_v40 = vadd.f32 1.0, %v2061_v39 }
 0x6eb   :  { %v2063_v42 = vpop.eup %2062 }
 0x6ec   :  { %2068 = vrcp.f32 %v1566_v40  ;;  %v1572_v43 = vadd.f32 1.0, %v2063_v42  ;;  %v2065_v44 = vpop.eup %2064 }
 0x6ed   :  { %v2067_v45 = vpop.eup %2066 }
 0x6ee   :  { %2070 = vrcp.f32 %v1572_v43  ;;  %v1579_v49 = vadd.f32 1.0, %v2067_v45 }
 0x6f0   :  { %2072 = vrcp.f32 %v1579_v49 }
 0x6f9   :  { %v2069_v46 = vpop.eup %2068 }
 0x6fa   :  { %v1583_v47 = vmul.f32 %v2069_v46, %v2065_v44 }
 0x6fb   :  { %v2071_v48 = vpop.eup %2070 }
 0x6fc   :  { %v1582_v51 = vmul.f32 %v2071_v48, %v3550_v54  ;;  %v1762_v54 = vld [vmem:[#allocation2 + $0x18] sm:$0xff] }
 0x6fd   :  { %v2073_v32 = vpop.eup %2072 }
 0x6fe   :  { %v3623_v52 = vadd.f32 %v1583_v47, %v1582_v51 }
 0x700   :  { %2074 = vtanh.f32 %v3623_v52 }
 0x70d   :  { %v2075_v29 = vpop.eup %2074 }
 0x70e   :  { %v1586_v16 = vmul.f32 %v2075_v29, %v2073_v32 }
 0x710   :  { %1652 = vmatmul.mubr.f32.vlgmr.msra.gmra.mxu0 %v1586_v16  ;;  %1723 = vmatmul.mubr.f32.vlgmr.msra.gmra.mxu1 %v1586_v16 }
 0x711   :  { %1925 = vmatpush3.msra.mxu0 %v1774_v26  ;;  %1956 = vmatprep.mubr.msk.f32.mxu0 %vm2182_vm1, %v3931_v3 }
 0x712   :  { %1926 = vmatprep.subr.mxu0 %v3931_v3 }
 0x713   :  { %1927 = vmatpush3.msra.mxu0 %v1773_v58 }
 0x714   :  { %1928 = vmatprep.subr.mxu0 %v3931_v3 }
 0x715   :  { %1929 = vmatpush3.msra.mxu0 %v1772_v13 }
 0x716   :  { %1930 = vmatprep.subr.mxu0 %v3931_v3 }
 0x717   :  { %1931 = vmatpush3.msra.mxu0 %v1771_v11 }
 0x718   :  { %1932 = vmatprep.subr.mxu0 %v3931_v3 }
 0x719   :  { %1933 = vmatpush3.msra.mxu0 %v1770_v12 }
 0x71a   :  { %1934 = vmatprep.subr.mxu0 %v3931_v3 }
 0x71b   :  { %1935 = vmatpush3.msra.mxu0 %v1769_v17 }
 0x71c   :  { %1936 = vmatprep.subr.mxu0 %v3931_v3 }
 0x71d   :  { %1937 = vmatpush3.msra.mxu0 %v1768_v15 }
 0x71e   :  { %1938 = vmatprep.subr.mxu0 %v3931_v3 }
 0x71f   :  { %1939 = vmatpush3.msra.mxu0 %v1767_v18 }
 0x720   :  { %1940 = vmatprep.subr.mxu0 %v3931_v3 }
 0x721   :  { %1941 = vmatpush3.msra.mxu0 %v1766_v10 }
 0x722   :  { %1942 = vmatprep.subr.mxu0 %v3931_v3 }
 0x723   :  { %1943 = vmatpush3.msra.mxu0 %v1765_v9 }
 0x724   :  { %1944 = vmatprep.subr.mxu0 %v3931_v3 }
 0x725   :  { %1945 = vmatpush3.msra.mxu0 %v1764_v8 }
 0x726   :  { %1946 = vmatprep.subr.mxu0 %v3931_v3 }
 0x727   :  { %1947 = vmatpush3.msra.mxu0 %v1763_v28 }
 0x728   :  { %1948 = vmatprep.subr.mxu0 %v3931_v3 }
 0x729   :  { %1949 = vmatpush3.msra.mxu0 %v1762_v54 }
 0x72a   :  { %1950 = vmatprep.subr.mxu0 %v3931_v3 }
 0x72b   :  { %1951 = vmatpush3.msra.mxu0 %v1761_v53 }
 0x72c   :  { %1952 = vmatprep.subr.mxu0 %v3931_v3 }
 0x72d   :  { %1953 = vmatpush3.msra.mxu0 %v1760_v50 }
 0x72e   :  { %1954 = vmatprep.subr.mxu0 %v3931_v3 }
 0x72f   :  { %1955 = vmatpush3.msra.mxu0 %v1759_v19 }
 0x7d0   :  { %v1653_v41 = vpop.f32.mrf.mxu0  ;;  %v1724_v63 = vpop.f32.mrf.mxu1 }
 0x7d1   :  { %v1729_v0 = vadd.f32 %v1653_v41, %v3937_v23  ;;  %v1731_v4 = vadd.f32 %v1724_v63, %v3940_v14 }
 0x7d2   :  { %v1655_v6 = vpop.f32.mrf.mxu0  ;;  %v1726_v62 = vpop.f32.mrf.mxu1 }
 0x7d3   :  { %v1903_v60 = vmul.f32 -1.442695, %v1729_v0  ;;  %v1730_v61 = vadd.f32 %v1655_v6, %v3938_v2  ;;  %v1732_v59 = vadd.f32 %v1726_v62, %v3939_v55 }
 0x7d5   :  { %2076 = vpow2.f32 %v1903_v60  ;;  %v1904_v5 = vmul.f32 -1.442695, %v1730_v61  ;;  %v1905_v7 = vmul.f32 -1.442695, %v1732_v59 }
 0x7d7   :  { %2078 = vpow2.f32 %v1904_v5 }
 0x7d8   :  { %2080 = vtanh.f32 %v1731_v4 }
 0x7d9   :  { %2082 = vpow2.f32 %v1905_v7 }
 0x7e2   :  { %v2077_v57 = vpop.eup %2076 }
 0x7e3   :  { %v1736_v3 = vadd.f32 1.0, %v2077_v57 }
 0x7e4   :  { %v2079_v1 = vpop.eup %2078 }
 0x7e5   :  { %2084 = vrcp.f32 %v1736_v3  ;;  %v1742_v56 = vadd.f32 1.0, %v2079_v1  ;;  %v2081_v30 = vpop.eup %2080 }
 0x7e6   :  { %v2083_v31 = vpop.eup %2082 }
 0x7e7   :  { %2086 = vrcp.f32 %v1742_v56  ;;  %v1749_v20 = vadd.f32 1.0, %v2083_v31 }
 0x7e9   :  { %2088 = vrcp.f32 %v1749_v20 }
 0x7f2   :  { %v2085_v34 = vpop.eup %2084 }
 0x7f3   :  { %v1753_v35 = vmul.f32 %v2085_v34, %v2081_v30 }
 0x7f4   :  { %v2087_v36 = vpop.eup %2086 }
 0x7f5   :  { %v1752_v21 = vmul.f32 %v2087_v36, %v3623_v52 }
 0x7f6   :  { %v2089_v24 = vpop.eup %2088 }
 0x7f7   :  { %v1754_v22 = vadd.f32 %v1753_v35, %v1752_v21 }
 0x7f9   :  { %1758 = vst [vmem:[%s3669_s10] sm:$0xff] %v1754_v22  ;;  %2090 = vtanh.f32 %v1754_v22 }
 0x806   :  { %v2091_v25 = vpop.eup %2090 }
 0x807   :  { %v1756_v27 = vmul.f32 %v2091_v25, %v2089_v24 }
 0x809   :  { %1757 = vst [vmem:[%s3668_s9] sm:$0xff] %v1756_v27  ;;  %1957 = vmatmul.mubr.f32.vlgmr.msra.gmra.mxu0 %v1756_v27 }
 0x8c9   :  { %v1848_v37 = vpop.f32.mrf.mxu0 }
 0x8ca   :  { %v1849_v38 = vadd.f32 %v1906_v33, %v1848_v37 }
 0x8cb   :  { %v1958_v39 = vpop.f32.mrf.mxu0 }
 0x8cc   :  { %1852 = vst [vmem:[%s3667_s8] sm:$0xff] %v1849_v38 }
 0x8cd   :  { %1865 = vsyncpa [#allocation3], 1 }

</bundles_post_ra>
